<compile_context>
chip_gen: v5e
topology: v5e:2x2
jax: 0.10.0
libtpu: 0.0.40
codegen_flags: <defaults>
</compile_context>

<pallas_src>
import jax
import jax.numpy as jnp
from jax.experimental import pallas as pl
from jax.experimental.pallas import tpu as pltpu


def _logreg_kernel(item_ref, user_ref, w_item_ref, w_user_ref, b_ref, out_ref):
    """One batch tile.

    item_ref   : VMEM (TB, S*D)  flattened item embeddings (f32 or bf16)
    user_ref   : VMEM (TB, D)    user embeddings (f32 or bf16)
    w_item_ref : VMEM (S*D, S)   block-diagonal item weight (same dtype as item)
    w_user_ref : VMEM (D, S)     user weight replicated over slate columns (same dtype as user)
    b_ref      : SMEM (1,)       Linear bias (output_dim == 1), f32
    out_ref    : VMEM (TB, S)    logits, f32
    """
    item_prec = (jax.lax.Precision.HIGHEST
                 if item_ref.dtype == jnp.float32 else jax.lax.Precision.DEFAULT)
    user_prec = (jax.lax.Precision.HIGHEST
                 if user_ref.dtype == jnp.float32 else jax.lax.Precision.DEFAULT)

    # (TB, S*D) @ (S*D, S) -> (TB, S): per-slate item scores on the MXU, f32 accumulation.
    item_score = jnp.dot(item_ref[...], w_item_ref[...],
                         preferred_element_type=jnp.float32, precision=item_prec)
    # (TB, D) @ (D, S) -> (TB, S): user score broadcast across the slate for free.
    user_score = jnp.dot(user_ref[...], w_user_ref[...],
                         preferred_element_type=jnp.float32, precision=user_prec)

    out_ref[...] = (item_score + user_score + b_ref[0]).astype(out_ref.dtype)


def _pick_batch_tile(B, S, D, in_itemsize, vmem_limit_bytes):
    """Pick a batch tile: big enough to hit the HBM roofline, small enough to double-buffer
    under the scoped VMEM limit, and never a single giant grid step when B can split."""
    lane = 128
    # Lane-padded VMEM bytes per batch row (flattened item tile + user tile + f32 out tile).
    bytes_per_row = (pl.cdiv(S * D, lane) * lane) * in_itemsize \
                  + (pl.cdiv(D, lane) * lane) * in_itemsize \
                  + (pl.cdiv(S, lane) * lane) * 4
    budget = vmem_limit_bytes // 2            # headroom for resident weights / compiler temps
    tb = budget // (2 * bytes_per_row)        # x2: double-buffered pipeline
    tb = min(tb, 2048)                        # ~1-4 MiB item tiles: past the ~85% roofline knee
    # Keep >= 4 (or >= 2) grid steps when each tile still has >= 256 rows, so DMA/compute
    # overlap works and both v7x TensorCores get their own tiles.
    for ntiles in (4, 2):
        if B >= ntiles * 256:
            tb = min(tb, pl.cdiv(B, ntiles))
            break
    if tb >= B:
        return B
    return max(8, (int(tb) // 8) * 8)         # sublane-aligned block rows


def logistic_regression_forward(item_embs, user_embs, weight, bias, *,
                                batch_tile=None,
                                vmem_limit_bytes=32 * 1024 * 1024):
    """weight: (1, 2D) torch.nn.Linear weight, bias: (1,). Returns (B, S) f32 logits."""
    B, S, D = item_embs.shape
    assert user_embs.shape == (B, D)
    assert weight.shape == (1, 2 * D)
    assert bias.shape == (1,)

    # stack_embeddings puts [item_embs, user_embs] on the last axis, so the first D columns
    # of W act on the item embedding and the last D on the user embedding.
    w = weight.astype(jnp.float32)
    w_item = w[0, :D]                                     # (D,)
    w_user = w[0, D:]                                     # (D,)

    # Block-diagonal item weight (S*D, S): row s*D+d, column j holds w_item[d] iff s == j.
    eye = jnp.eye(S, dtype=jnp.float32)
    w_item_blk = (eye[:, None, :] * w_item[None, :, None]).reshape(S * D, S)
    # User weight replicated across the S slate columns: (D, S).
    w_user_rep = jnp.broadcast_to(w_user[:, None], (D, S))

    # Match MXU operand dtypes to the streaming inputs (bf16 weights for bf16 embeddings ->
    # native bf16 MXU path with f32 accumulation; no per-tile VPU upcast on v5e).
    w_item_blk = w_item_blk.astype(item_embs.dtype)
    w_user_rep = jnp.asarray(w_user_rep, user_embs.dtype)
    bias_f32 = bias.astype(jnp.float32)

    item2d = item_embs.reshape(B, S * D)                  # contiguous reshape: free in HBM

    in_itemsize = jnp.dtype(item_embs.dtype).itemsize
    tb = batch_tile if batch_tile is not None else _pick_batch_tile(
        B, S, D, in_itemsize, vmem_limit_bytes)
    tb = min(int(tb), B)
    if tb < B and tb % 8 != 0:
        tb = max(8, (tb // 8) * 8)                        # keep block rows sublane-aligned
    grid = (pl.cdiv(B, tb),)

    cost = pl.CostEstimate(
        flops=2 * B * (S * D) * S + 2 * B * D * S + 2 * B * S,
        transcendentals=0,
        bytes_accessed=(B * S * D + B * D) * in_itemsize
                       + (S * D * S + D * S) * in_itemsize + 4 + B * S * 4,
    )

    out = pl.pallas_call(
        _logreg_kernel,
        out_shape=jax.ShapeDtypeStruct((B, S), jnp.float32),
        grid=grid,
        in_specs=[
            pl.BlockSpec((tb, S * D), lambda i: (i, 0)),          # item tile (pipelined DMA)
            pl.BlockSpec((tb, D), lambda i: (i, 0)),              # user tile (pipelined DMA)
            pl.BlockSpec((S * D, S), lambda i: (0, 0)),           # block-diag item weight (resident)
            pl.BlockSpec((D, S), lambda i: (0, 0)),               # replicated user weight (resident)
            pl.BlockSpec(memory_space=pltpu.MemorySpace.SMEM),    # bias scalar
        ],
        out_specs=pl.BlockSpec((tb, S), lambda i: (i, 0)),        # logits, no transpose
        compiler_params=pltpu.CompilerParams(
            dimension_semantics=("parallel",),   # megacore sharding on v7x; no-op on v5e/v6e
            vmem_limit_bytes=vmem_limit_bytes,
        ),
        cost_estimate=cost,
    )(item2d, user_embs, w_item_blk, w_user_rep, bias_f32)

    return out   # (B, S) f32


if __name__ == "__main__":
    B, S, D = 256, 8, 64          # batch, slate size, embedding_dim
    n_items, n_users = 1000, 300

    key = jax.random.PRNGKey(0)
    k_it, k_ut, k_w, k_b, k_ii, k_ui = jax.random.split(key, 6)

    # Deterministic synthetic "embedding" module: plain-JAX table lookups (wrapper glue).
    item_table = jax.random.normal(k_it, (n_items, D), jnp.float32)
    user_table = jax.random.normal(k_ut, (n_users, D), jnp.float32)

    # torch.nn.Linear(2*D, 1) parameters, initialized deterministically in-script.
    weight = jax.random.normal(k_w, (1, 2 * D), jnp.float32) / jnp.sqrt(2.0 * D)
    bias = jax.random.normal(k_b, (1,), jnp.float32) * 0.01

    item_idx = jax.random.randint(k_ii, (B, S), 0, n_items)
    user_idx = jax.random.randint(k_ui, (B,), 0, n_users)

    item_embs = item_table[item_idx]     # (B, S, D) f32
    user_embs = user_table[user_idx]     # (B, D)    f32

    def reference(it, us, w_f32, b_f32):
        # Exact PyTorch forward (concat -> Linear -> squeeze), elementwise+sum in f32.
        feats = jnp.concatenate(
            [it, jnp.broadcast_to(us[:, None, :], it.shape)], axis=-1)
        return jnp.sum(feats * w_f32[0], axis=-1) + b_f32[0]

    # f32 path, explicit small tile -> 4-step grid (exercises the pipelined/parallel axis).
    out_f32 = logistic_regression_forward(item_embs, user_embs, weight, bias, batch_tile=64)
    out_f32 = jax.block_until_ready(out_f32)
    ref_f32 = reference(item_embs, user_embs, weight, bias)
    assert out_f32.shape == (B, S), out_f32.shape
    assert jnp.allclose(out_f32, ref_f32, atol=1e-4, rtol=1e-4), \
        float(jnp.max(jnp.abs(out_f32 - ref_f32)))

    # f32 path, default tile heuristic (single tile at this small B).
    out_def = logistic_regression_forward(item_embs, user_embs, weight, bias)
    out_def = jax.block_until_ready(out_def)
    assert jnp.allclose(out_def, ref_f32, atol=1e-4, rtol=1e-4), \
        float(jnp.max(jnp.abs(out_def - ref_f32)))

    # bf16 embeddings (production path: halves HBM read traffic). The kernel runs the native
    # bf16 MXU path with bf16-cast weights and f32 accumulation; the reference mirrors that
    # rounding so the check is exact-to-accumulation-order.
    item_bf16 = item_embs.astype(jnp.bfloat16)
    user_bf16 = user_embs.astype(jnp.bfloat16)
    w_bf16_as_f32 = weight.astype(jnp.bfloat16).astype(jnp.float32)
    out_bf16 = logistic_regression_forward(item_bf16, user_bf16, weight, bias, batch_tile=64)
    out_bf16 = jax.block_until_ready(out_bf16)
    ref_bf16 = reference(item_bf16.astype(jnp.float32), user_bf16.astype(jnp.float32),
                         w_bf16_as_f32, bias)
    assert jnp.allclose(out_bf16, ref_bf16, atol=1e-4, rtol=1e-4), \
        float(jnp.max(jnp.abs(out_bf16 - ref_bf16)))

    print("KERNEL_OK")
</pallas_src>

<mosaic_0001>
module attributes {stable_mosaic.version = 11 : i64} {
  func.func @_logreg_kernel(%arg0: i32, %arg1: memref<64x512xf32, #tpu.memory_space<vmem>>, %arg2: memref<64x64xf32, #tpu.memory_space<vmem>>, %arg3: memref<512x8xf32, #tpu.memory_space<vmem>>, %arg4: memref<64x8xf32, #tpu.memory_space<vmem>>, %arg5: memref<1xf32, #tpu.memory_space<smem>>, %arg6: memref<64x8xf32, #tpu.memory_space<vmem>>) attributes {dimension_semantics = [#tpu.dimension_semantics<parallel>], iteration_bounds = array<i64: 4>, scalar_prefetch = 0 : i64, scratch_operands = 0 : i64, tpu.core_type = #tpu.core_type<tc>, window_params = [{transform_indices = @transform_0, window_bounds = array<i64: 64, 512>}, {transform_indices = @transform_1, window_bounds = array<i64: 64, 64>}, {pipeline_mode = #tpu.pipeline_mode<synchronous>, transform_indices = @transform_2, window_bounds = array<i64: 512, 8>}, {pipeline_mode = #tpu.pipeline_mode<synchronous>, transform_indices = @transform_3, window_bounds = array<i64: 64, 8>}, {transform_indices = @transform_4, window_bounds = array<i64: 1>}, {transform_indices = @transform_5, window_bounds = array<i64: 64, 8>}]} {
    %c0 = arith.constant 0 : index
    %c0_0 = arith.constant 0 : index
    %0 = vector.load %arg1[%c0, %c0_0] : memref<64x512xf32, #tpu.memory_space<vmem>>, vector<64x512xf32>
    %c0_1 = arith.constant 0 : index
    %c0_2 = arith.constant 0 : index
    %1 = vector.load %arg3[%c0_1, %c0_2] : memref<512x8xf32, #tpu.memory_space<vmem>>, vector<512x8xf32>
    %cst = arith.constant dense<0.000000e+00> : vector<64x8xf32>
    %2 = tpu.matmul %0, %1, %cst {dimension_numbers = #tpu.dot_dimension_numbers<[1], [0], [0], [1], [0, 0, 1, 1], [], []>, precision = #tpu.contract_precision<fp32>} : vector<64x512xf32>, vector<512x8xf32>, vector<64x8xf32> -> vector<64x8xf32>
    %c0_3 = arith.constant 0 : index
    %c0_4 = arith.constant 0 : index
    %3 = vector.load %arg2[%c0_3, %c0_4] : memref<64x64xf32, #tpu.memory_space<vmem>>, vector<64x64xf32>
    %c0_5 = arith.constant 0 : index
    %c0_6 = arith.constant 0 : index
    %4 = vector.load %arg4[%c0_5, %c0_6] : memref<64x8xf32, #tpu.memory_space<vmem>>, vector<64x8xf32>
    %cst_7 = arith.constant dense<0.000000e+00> : vector<64x8xf32>
    %5 = tpu.matmul %3, %4, %cst_7 {dimension_numbers = #tpu.dot_dimension_numbers<[1], [0], [0], [1], [0, 0, 1, 1], [], []>, precision = #tpu.contract_precision<fp32>} : vector<64x64xf32>, vector<64x8xf32>, vector<64x8xf32> -> vector<64x8xf32>
    %6 = arith.addf %2, %5 : vector<64x8xf32>
    %c0_8 = arith.constant 0 : index
    %7 = memref.load %arg5[%c0_8] : memref<1xf32, #tpu.memory_space<smem>>
    %8 = vector.broadcast %7 : f32 to vector<64x8xf32>
    %9 = arith.addf %6, %8 : vector<64x8xf32>
    %c0_9 = arith.constant 0 : index
    %c0_10 = arith.constant 0 : index
    %10 = vector.load %arg6[%c0_9, %c0_10] : memref<64x8xf32, #tpu.memory_space<vmem>>, vector<64x8xf32>
    tpu.vector_store %arg6[%c0_9, %c0_10], %9 {strides = array<i32>} : memref<64x8xf32, #tpu.memory_space<vmem>>, vector<64x8xf32>,
    return
  }
  func.func @transform_0(%arg0: i32) -> (i32, i32) {
    %c0_i32 = arith.constant 0 : i32
    %c0_i32_0 = arith.constant 0 : i32
    return %arg0, %c0_i32 : i32, i32
  }
  func.func @transform_1(%arg0: i32) -> (i32, i32) {
    %c0_i32 = arith.constant 0 : i32
    %c0_i32_0 = arith.constant 0 : i32
    return %arg0, %c0_i32 : i32, i32
  }
  func.func @transform_2(%arg0: i32) -> (i32, i32) {
    %c0_i32 = arith.constant 0 : i32
    %c0_i32_0 = arith.constant 0 : i32
    %c0_i32_1 = arith.constant 0 : i32
    return %c0_i32, %c0_i32_0 : i32, i32
  }
  func.func @transform_3(%arg0: i32) -> (i32, i32) {
    %c0_i32 = arith.constant 0 : i32
    %c0_i32_0 = arith.constant 0 : i32
    %c0_i32_1 = arith.constant 0 : i32
    return %c0_i32, %c0_i32_0 : i32, i32
  }
  func.func @transform_4(%arg0: i32) -> i32 {
    %c0_i32 = arith.constant 0 : i32
    %c0_i32_0 = arith.constant 0 : i32
    return %c0_i32 : i32
  }
  func.func @transform_5(%arg0: i32) -> (i32, i32) {
    %c0_i32 = arith.constant 0 : i32
    %c0_i32_0 = arith.constant 0 : i32
    return %arg0, %c0_i32 : i32, i32
  }
}

</mosaic_0001>

<bundles_post_ra>
// kernel: tpu_custom_call.1
= control target key start
LH: loop header
LB: loop body
LE: loop exit
PB: predicated region body
PF: predicated region fallthrough
CT: control target
= control target key end

     0   :  { %s5680_s0 = inlined_call_operand.hbm [shape: f32[256,512], index: 0, kind: input, shape index: {}]   ;;  %s5681_s1 = inlined_call_operand.vmem [shape: f32[256,64], index: 1, kind: input, shape index: {}]   ;;  %s5682_s2 = inlined_call_operand.vmem [shape: f32[512,8], index: 2, kind: input, shape index: {}]   ;;  %s5683_s3 = inlined_call_operand.vmem [shape: f32[64,8], index: 3, kind: input, shape index: {}]   ;;  %s5684_s4 = inlined_call_operand.<no memory space> [shape: f32[1], index: 4, kind: input, shape index: {}]   ;;  %s5685_s5 = inlined_call_operand.vmem [shape: f32[256,8], index: 5, kind: output, shape index: {}]  }
   0x1   :  { %10 = sst [smem:[#allocation2]] %s5684_s4 }
   0x2   :  { %11 = vsyncpa [#allocation4], 0 }
   0x3   :  { %13 = vsyncpa [#allocation4 + $0x1], 0  ;;  %s3370_s20 = smov 0   ;;  %s3372_s21 = smov 0  }
   0x4   :  { %s3374_s22 = smov 0   ;;  %s3376_s23 = smov 0  }
   0x5 LB: > { %s3194_s4 = sadd.s32 4294967295, %s3333_s23   ;;  %s3390_s24 = sadd.s32 1, %s3333_s23   ;;  %s3333_s23 = sphi %s3376_s23, %s5802_s23   ;;  %s3329_s22 = sphi %s3374_s22, %s5801_s22   ;;  %s3325_s21 = sphi %s3372_s21, %s5800_s21   ;;  %s3321_s20 = sphi %s3370_s20, %s5799_s20  }
   0x6   : > { %s23_s25 = ssub.s32 %s3333_s23, %s3390_s24  ;;  %s26_s26 = sadd.s32 1, %s3329_s22 }
   0x7   : > { %p24_p0 = scmp.eq.s32.totalorder %s23_s25, 0  ;;  %p33_p1 = scmp.ne.s32.totalorder %s3329_s22, %s3325_s21 }
   0x8   : > { %p34_p2 = scmp.eq.s32.totalorder %s3333_s23, 0  ;;  %p39_p3 = scmp.ne.s32.totalorder %s3325_s21, %s3321_s20 }
   0x9   : > { %s3400_s27 = scalar_select %p24_p0, %s3329_s22, %s26_s26  }
   0xa   : > { %p3402_p4 = por %p34_p2, %p33_p1  ;;  %p40_p5 = scmp.eq.s32.totalorder %s3194_s4, 0 }
   0xb   : > { %p3234_p6 = scmp.lt.s32.totalorder %s3333_s23, 4  ;;  %s187_s30 = sand.u32 1, %s3329_s22  }
   0xc   : > { %p3409_p7 = por %p40_p5, %p39_p3  ;;  %s3198_s6 = sshll.u32 %s187_s30, 8 }
   0xd   : > { %s3211_s7 = sshll.u32 %s3333_s23, 8  ;;  %s191_s11 = scalar_lea.vmem [#allocation3], %s3198_s6 }
   0xe   : > { %s197_s10 = scalar_lea.hbm %s5680_s0, %s3211_s7  ;;  %s200_s12 = sshll.u32 %s191_s11, 4  ;;  %s201_s12 = int_to_ptr.vmem [resolvable:$true] %s200_s12 }
   0xf   : > { %s198_s13 = sshll.u32 %s197_s10, 4  ;;  %p3420_p8 = pnand %p3234_p6, %p3402_p4  ;;  %s199_s13 = int_to_ptr.hbm [resolvable:$true] %s198_s13 }
  0x10   : > { %p3202_p9 = scmp.ge.s32.totalorder %s3333_s23, 1  ;;  %s188_s15 = scalar_lea.sflag [#allocation4], %s187_s30 }
  0x11   : > { %s3269_s16 = sshra.s32 %s199_s13, 4  ;;  %p3273_p11 = pneg %p3420_p8  ;;  %s3270_s16 = int_to_ptr.hbm [resolvable:$true] %s3269_s16 }
  0x12   : > { %s3271_s17 = scalar_lea.hbm %s3270_s16, 256  ;;  %s3276_s20 = scalar_lea.hbm %s5680_s0, 1024 }
  0x13   : > { %p3272_p10 = scmp.ne.s32.totalorder %s3270_s16, %s3271_s17  ;;  %p3277_p0 = scmp.lt.s32.totalorder %s3270_s16, %s5680_s0 }
  0x14   : > { %p3278_p1 = scmp.lt.s32.totalorder %s3276_s20, %s3271_s17 }
  0x15   : > { %p3274_p12 = pnand %p3273_p11, %p3272_p10 }
  0x16   : > { %p3279_p2 = por %p3278_p1, %p3277_p0 }
  0x17   : > { %p3275_p13 = pneg %p3274_p12 }
  0x19   : > { %p3280_p3 = pnand %p3279_p2, %p3275_p13 }
  0x1b   : > { %3283 = shalt.err (!%p3280_p3)
}
  0x1c   : > { %s3335_s28 = smov 512   ;;  %s3336_s30 = smov 32  }
  0x1d   : > { %3233 = dma.hbm_to_vmem [thread:$0]  (!%p3420_p8), %s199_s13, 4096, %s201_s12, %s188_s15, %s3335_s28, %s3335_s28, %s3336_s30  }
  0x1e   : > { %p217_p4 = scmp.lt.s32.totalorder %s3333_s23, 5 }
  0x20   : > { %p218_p5 = pnand %p3202_p9, %p217_p4 }
  0x22   : > { %221 = sbr.rel (%p218_p5) target bundleno = 683 (0x2ab), region = 40 }
  0x27   : > { %s223_s6 = sand.u32 1, %s3325_s21  }
  0x28   : > { %s3203_s7 = sshll.u32 %s223_s6, 8  ;;  %s224_s8 = scalar_lea.sflag [#allocation4], %s223_s6 }
  0x29   : > { %s3439_s9 = scalar_lea.vmem [#allocation3], %s3203_s7 }
  0x2a   : > { %3316 = dma.done.wait (%p3409_p7), %s224_s8, 4096  }
  0x2b   : > { %3318 = vsyncadd (%p3409_p7), %s224_s8, 4294963200  ;;  %s3204_s10 = sshll.u32 %s3194_s4, 3  ;;  %v384_v0 = vld [vmem:[%s5683_s3 + $0x38] sm:$0xff]  ;;  %v383_v1 = vld [vmem:[%s5683_s3 + $0x30] sm:$0xff]  ;;  %vm385_vm0 = vcmask 523264   ;;  %vm3106_vm1 = vcmask 64512  }
  0x2c   : > { %p262_p6 = scmp.lt.s32.totalorder %s3204_s10, 31  ;;  %v382_v2 = vld [vmem:[%s5683_s3 + $0x28] sm:$0xff]  ;;  %v3466_v3 = vand.u32 4294901760, %v384_v0  ;;  %v3468_v4 = vand.u32 4294901760, %v383_v1  ;;  %v381_v6 = vld [vmem:[%s5683_s3 + $0x20] sm:$0xff]  ;;  %v380_v7 = vld [vmem:[%s5683_s3 + $0x18] sm:$0xff] }
  0x2d   : > { %v3470_v5 = vand.u32 4294901760, %v382_v2  ;;  %v379_v8 = vld [vmem:[%s5683_s3 + $0x10] sm:$0xff]  ;;  %v3481_v9 = vand.u32 4294901760, %v381_v6  ;;  %v3483_v10 = vand.u32 4294901760, %v380_v7  ;;  %v378_v12 = vld [vmem:[%s5683_s3 + $0x8] sm:$0xff]  ;;  %v377_v13 = vld [vmem:[%s5683_s3] sm:$0xff] }
  0x2e   : > { %s5804_s10 = smov (!%p262_p6, %s3204_s10), 31  ;;  %v3485_v11 = vand.u32 4294901760, %v379_v8  ;;  %3212 = vmatpush.msra.mxu2 %v3466_v3  ;;  %v3496_v15 = vsub.f32 %v384_v0, %v3466_v3  ;;  %v3499_v16 = vsub.f32 %v383_v1, %v3468_v4  ;;  %v3501_v17 = vand.u32 4294901760, %v378_v12  ;;  %419 = vmatpush.msra.mxu0 %v3466_v3 }
  0x2f   : > { %s3205_s11 = sshll.u32 %s5804_s10, 3  ;;  %v3504_v18 = vsub.f32 %v382_v2, %v3470_v5  ;;  %v3507_v19 = vand.u32 4294901760, %v377_v13  ;;  %v3510_v20 = vsub.f32 %v381_v6, %v3481_v9  ;;  %v3514_v22 = vsub.f32 %v380_v7, %v3483_v10 }
  0x30   : > { %s3455_s14 = scalar_lea.vmem %s5681_s1, %s3205_s11  ;;  %3213 = vmatpush.msra.mxu2 %v3468_v4  ;;  %v509_v23 = vand.u32 4294901760, %v3496_v15  ;;  %v515_v24 = vand.u32 4294901760, %v3499_v16  ;;  %421 = vmatpush.msra.mxu0 %v3468_v4  ;;  %v3526_v29 = vsub.f32 %v379_v8, %v3485_v11  ;;  %v3529_v30 = vsub.f32 %v378_v12, %v3501_v17  ;;  %s5619_s6 = scalar_lea.vmem %s5685_s5, %s3205_s11 }
  0x31   : > { %v373_v14 = vld [vmem:[%s3455_s14 + $0x20] sm:$0xff]  ;;  %v521_v25 = vand.u32 4294901760, %v3504_v18  ;;  %v527_v27 = vand.u32 4294901760, %v3510_v20  ;;  %v533_v28 = vand.u32 4294901760, %v3514_v22  ;;  %v374_v37 = vld [vmem:[%s3455_s14 + $0x28] sm:$0xff]  ;;  %v375_v45 = vld [vmem:[%s3455_s14 + $0x30] sm:$0xff]  ;;  %v3565_v48 = vsub.f32 %v377_v13, %v3507_v19 }
  0x32   : > { %v399_v21 = vsel %vm385_vm0, %v373_v14, 0  ;;  %3214 = vmatpush.msra.mxu2 %v3470_v5  ;;  %v510_v31 = vsub.f32 %v3496_v15, %v509_v23  ;;  %v516_v32 = vsub.f32 %v3499_v16, %v515_v24  ;;  %v539_v36 = vand.u32 4294901760, %v3526_v29  ;;  %423 = vmatpush.msra.mxu0 %v3470_v5  ;;  %v369_v38 = vld [vmem:[%s3455_s14] sm:$0xff]  ;;  %v370_v46 = vld [vmem:[%s3455_s14 + $0x8] sm:$0xff]  ;;  %v371_v55 = vld [vmem:[%s3455_s14 + $0x10] sm:$0xff] }
  0x33   : > { %v3520_v26 = vand.u32 4294901760, %v399_v21  ;;  %v522_v33 = vsub.f32 %v3504_v18, %v521_v25  ;;  %v528_v35 = vsub.f32 %v3510_v20, %v527_v27  ;;  %v534_v43 = vsub.f32 %v3514_v22, %v533_v28  ;;  %v376_v0 = vld [vmem:[%s3455_s14 + $0x38] sm:$0xff] }
  0x34   : > { %3215 = vmatpush.msra.mxu2 %v3481_v9  ;;  %v511_v39 = vand.u32 4294901760, %v510_v31  ;;  %v517_v40 = vand.u32 4294901760, %v516_v32  ;;  %v545_v44 = vand.u32 4294901760, %v3529_v30  ;;  %425 = vmatpush.msra.mxu0 %v3481_v9  ;;  %v402_v49 = vsel %vm385_vm0, %v374_v37, 0 }
  0x35   : > { %v3542_v34 = vsub.f32 %v399_v21, %v3520_v26  ;;  %v523_v42 = vand.u32 4294901760, %v522_v33  ;;  %v387_v50 = vsel %vm385_vm0, %v369_v38, 0  ;;  %v529_v51 = vand.u32 4294901760, %v528_v35  ;;  %v372_v38 = vld [vmem:[%s3455_s14 + $0x18] sm:$0xff] }
  0x36   : > { %3216 = vmatpush.msra.mxu2 %v3483_v10  ;;  %3220 = vmatpush.msra.mxu3 %v511_v39  ;;  %v540_v52 = vsub.f32 %v3526_v29, %v539_v36  ;;  %v3572_v53 = vand.u32 4294901760, %v402_v49  ;;  %v3575_v54 = vand.u32 4294901760, %v387_v50  ;;  %v551_v57 = vand.u32 4294901760, %v3565_v48 }
  0x37   : > { %v468_v41 = vand.u32 4294901760, %v3542_v34  ;;  %512 = vmatpush.msra.mxu1 %v511_v39  ;;  %427 = vmatpush.msra.mxu0 %v3483_v10  ;;  %v405_v58 = vsel %vm385_vm0, %v375_v45, 0  ;;  %v390_v59 = vsel %vm385_vm0, %v370_v46, 0  ;;  %v535_v1 = vand.u32 4294901760, %v534_v43  ;;  %v320_v45 = vld [vmem:[%s5682_s2 + $0x78] sm:$0xff] }
  0x38   : > { %3217 = vmatpush.msra.mxu2 %v3485_v11  ;;  %3221 = vmatpush.msra.mxu3 %v517_v40  ;;  %v3583_v60 = vsub.f32 %v402_v49, %v3572_v53  ;;  %v3587_v61 = vsub.f32 %v387_v50, %v3575_v54  ;;  %v3589_v62 = vand.u32 4294901760, %v405_v58  ;;  %v3591_v63 = vand.u32 4294901760, %v390_v59 }
  0x39   : > { %v469_v47 = vsub.f32 %v3542_v34, %v468_v41  ;;  %518 = vmatpush.msra.mxu1 %v517_v40  ;;  %429 = vmatpush.msra.mxu0 %v3485_v11  ;;  %v546_v2 = vsub.f32 %v3529_v30, %v545_v44  ;;  %v393_v6 = vsel %vm385_vm0, %v371_v55, 0  ;;  %v541_v13 = vand.u32 4294901760, %v540_v52 }
  0x3a   : > { %3218 = vmatpush.msra.mxu2 %v3501_v17  ;;  %3222 = vmatpush.msra.mxu3 %v523_v42  ;;  %v476_v7 = vand.u32 4294901760, %v3583_v60  ;;  %v436_v8 = vand.u32 4294901760, %v3587_v61  ;;  %v3603_v12 = vsub.f32 %v390_v59, %v3591_v63  ;;  %v552_v14 = vsub.f32 %v3565_v48, %v551_v57 }
  0x3b   : > { %v470_v56 = vand.u32 4294901760, %v469_v47  ;;  %524 = vmatpush.msra.mxu1 %v523_v42  ;;  %431 = vmatpush.msra.mxu0 %v3501_v17  ;;  %v3610_v21 = vsub.f32 %v405_v58, %v3589_v62  ;;  %v408_v31 = vsel %vm385_vm0, %v376_v0, 0  ;;  %v3620_v37 = vand.u32 4294901760, %v393_v6 }
  0x3c   : > { %3219 = vmatpush.msra.mxu2 %v3507_v19  ;;  %3223 = vmatpush.msra.mxu3 %v529_v51  ;;  %v477_v32 = vsub.f32 %v3583_v60, %v476_v7  ;;  %v437_v33 = vsub.f32 %v3587_v61, %v436_v8  ;;  %v444_v35 = vand.u32 4294901760, %v3603_v12  ;;  %v547_v39 = vand.u32 4294901760, %v546_v2 }
  0x3d   : > { %471 = vmatmul.f32.vlgmr.msra.gmra.mxu2 %v470_v56  ;;  %530 = vmatpush.msra.mxu1 %v529_v51  ;;  %v553_v42 = vand.u32 4294901760, %v552_v14  ;;  %v3626_v43 = vand.u32 4294901760, %v408_v31  ;;  %v396_v46 = vsel %vm385_vm0, %v372_v38, 0  ;;  %v484_v49 = vand.u32 4294901760, %v3610_v21  ;;  %v317_v38 = vld [vmem:[%s5682_s2 + $0x60] sm:$0xff] }
  0x3e   : > { %3224 = vmatpush.msra.mxu3 %v535_v1  ;;  %598 = vmatpush.msrb.mxu2 %v3496_v15  ;;  %v438_v40 = vand.u32 4294901760, %v437_v33  ;;  %v478_v47 = vand.u32 4294901760, %v477_v32  ;;  %v445_v50 = vsub.f32 %v3603_v12, %v444_v35  ;;  %v3637_v51 = vsub.f32 %v393_v6, %v3620_v37 }
  0x3f   : > { %536 = vmatpush.msra.mxu1 %v535_v1  ;;  %433 = vmatpush.msra.mxu0 %v3507_v19  ;;  %v3642_v52 = vand.u32 4294901760, %v320_v45  ;;  %v3646_v55 = vsub.f32 %v408_v31, %v3626_v43  ;;  %v3648_v56 = vand.u32 4294901760, %v396_v46  ;;  %v485_v58 = vsub.f32 %v3610_v21, %v484_v49  ;;  %v318_v1 = vld [vmem:[%s5682_s2 + $0x68] sm:$0xff] }
  0x40   : > { %3225 = vmatpush.msra.mxu3 %v541_v13  ;;  %601 = vmatpush.msrb.mxu2 %v3499_v16  ;;  %v446_v59 = vand.u32 4294901760, %v445_v50  ;;  %v452_v15 = vand.u32 4294901760, %v3637_v51  ;;  %v3683_v31 = vand.u32 4294901760, %v318_v1 }
  0x41   : > { %542 = vmatpush.msra.mxu1 %v541_v13  ;;  %439 = vmatmul.f32.vlgmr.msra.gmra.mxu0 %v438_v40  ;;  %v3668_v2 = vsub.f32 %v320_v45, %v3642_v52  ;;  %v5688_v6 = vand.u32 4294901760, %v3646_v55  ;;  %v3674_v13 = vsub.f32 %v396_v46, %v3648_v56  ;;  %v486_v14 = vand.u32 4294901760, %v485_v58 }
  0x42   : > { %3226 = vmatpush.msra.mxu3 %v547_v39  ;;  %604 = vmatpush.msrb.mxu2 %v3504_v18  ;;  %v453_v16 = vsub.f32 %v3637_v51, %v452_v15 }
  0x43   : > { %548 = vmatpush.msra.mxu1 %v547_v39  ;;  %745 = vmatpush.msrb.mxu0 %v509_v23  ;;  %v319_v23 = vld [vmem:[%s5682_s2 + $0x70] sm:$0xff]  ;;  %v460_v32 = vand.u32 4294901760, %v3674_v13  ;;  %v316_v39 = vld [vmem:[%s5682_s2 + $0x58] sm:$0xff] }
  0x44   : > { %3227 = vmatpush.msra.mxu3 %v553_v42  ;;  %607 = vmatpush.msrb.mxu2 %v3510_v20  ;;  %v3659_v0 = vand.u32 4294901760, %v319_v23  ;;  %v454_v33 = vand.u32 4294901760, %v453_v16 }
  0x45   : > { %479 = vmatmul.f32.gmra.mxu2 %v478_v47  ;;  %572 = vmatmul.f32.vlgmr.msra.gmra.mxu3 %v3520_v26  ;;  %v461_v45 = vsub.f32 %v3674_v13, %v460_v32  ;;  %v3731_v47 = vand.u32 4294901760, %v316_v39 }
  0x46   : > { %670 = vmatpush.msrb.mxu3 %v3466_v3  ;;  %554 = vmatpush.msra.mxu1 %v553_v42 }
  0x47   : > { %556 = vmatmul.f32.vlgmr.msra.gmra.mxu1 %v3575_v54  ;;  %749 = vmatpush.msrb.mxu0 %v515_v24  ;;  %v3681_v24 = vsub.f32 %v319_v23, %v3659_v0  ;;  %v314_v23 = vld [vmem:[%s5682_s2 + $0x48] sm:$0xff] }
  0x48   : > { %672 = vmatpush.msrb.mxu3 %v3468_v4  ;;  %816 = vmatpush.msrb.mxu1 %v3466_v3  ;;  %v963_v3 = vand.u32 4294901760, %v3668_v2 }
  0x49   : > { %610 = vmatpush.msrb.mxu2 %v3514_v22  ;;  %447 = vmatmul.f32.gmra.mxu0 %v446_v59  ;;  %v969_v18 = vand.u32 4294901760, %v3681_v24  ;;  %v462_v22 = vand.u32 4294901760, %v461_v45  ;;  %v3747_v59 = vsub.f32 %v316_v39, %v3731_v47 }
  0x4a   : > { %674 = vmatpush.msrb.mxu3 %v3470_v5  ;;  %818 = vmatpush.msrb.mxu1 %v3468_v4  ;;  %v493_v4 = vsub.f32 %v3646_v55, %v5688_v6  ;;  %v964_v40 = vsub.f32 %v3668_v2, %v963_v3 }
  0x4b   : > { %753 = vmatpush.msrb.mxu0 %v521_v25  ;;  %613 = vmatpush.msrb.mxu2 %v3526_v29  ;;  %v3700_v25 = vsub.f32 %v318_v1, %v3683_v31  ;;  %v970_v46 = vsub.f32 %v3681_v24, %v969_v18 }
  0x4c   : > { %676 = vmatpush.msrb.mxu3 %v3481_v9  ;;  %820 = vmatpush.msrb.mxu1 %v3470_v5  ;;  %v3708_v5 = vand.u32 4294901760, %v317_v38  ;;  %v965_v50 = vand.u32 4294901760, %v964_v40 }
  0x4d   : > { %487 = vmatmul.f32.gmra.mxu2 %v486_v14  ;;  %576 = vmatmul.f32.gmra.mxu3 %v3572_v53  ;;  %v975_v42 = vand.u32 4294901760, %v3700_v25  ;;  %v987_v14 = vand.u32 4294901760, %v3747_v59 }
  0x4e   : > { %678 = vmatpush.msrb.mxu3 %v3483_v10  ;;  %757 = vmatpush.msrb.mxu0 %v527_v27  ;;  %v3722_v20 = vsub.f32 %v317_v38, %v3708_v5  ;;  %v494_v27 = vand.u32 4294901760, %v493_v4  ;;  %v312_v38 = vld [vmem:[%s5682_s2 + $0x38] sm:$0xff] }
  0x4f   : > { %560 = vmatmul.f32.gmra.mxu1 %v3591_v63  ;;  %616 = vmatpush.msrb.mxu2 %v3529_v30  ;;  %v976_v58 = vsub.f32 %v3700_v25, %v975_v42  ;;  %v988_v30 = vsub.f32 %v3747_v59, %v987_v14 }
  0x50   : > { %680 = vmatpush.msrb.mxu3 %v3485_v11  ;;  %822 = vmatpush.msrb.mxu1 %v3481_v9  ;;  %v981_v9 = vand.u32 4294901760, %v3722_v20 }
  0x51   : > { %619 = vmatpush.msrb.mxu2 %v3565_v48  ;;  %455 = vmatmul.f32.gmra.mxu0 %v454_v33  ;;  %v977_v1 = vand.u32 4294901760, %v976_v58  ;;  %v989_v48 = vand.u32 4294901760, %v988_v30 }
  0x52   : > { %682 = vmatpush.msrb.mxu3 %v3501_v17  ;;  %761 = vmatpush.msrb.mxu0 %v533_v28  ;;  %v971_v28 = vand.u32 4294901760, %v970_v46  ;;  %v982_v29 = vsub.f32 %v3722_v20, %v981_v9  ;;  %v3811_v46 = vand.u32 4294901760, %v312_v38 }
  0x53   : > { %824 = vmatpush.msrb.mxu1 %v3483_v10  ;;  %865 = vmatpush.msra.mxu2 %v3642_v52  ;;  %v315_v10 = vld [vmem:[%s5682_s2 + $0x50] sm:$0xff] }
  0x54   : > { %684 = vmatpush.msrb.mxu3 %v3507_v19  ;;  %765 = vmatpush.msrb.mxu0 %v539_v36  ;;  %v3758_v36 = vand.u32 4294901760, %v315_v10  ;;  %v983_v16 = vand.u32 4294901760, %v982_v29 }
  0x55   : > { %495 = vmatmul.f32.gmra.mxu2 %v494_v27  ;;  %580 = vmatmul.f32.gmra.mxu3 %v3589_v62 }
  0x56   : > { %826 = vmatpush.msrb.mxu1 %v3485_v11  ;;  %769 = vmatpush.msrb.mxu0 %v545_v44  ;;  %v3768_v11 = vsub.f32 %v315_v10, %v3758_v36  ;;  %v3773_v44 = vand.u32 4294901760, %v314_v23  ;;  %v311_v10 = vld [vmem:[%s5682_s2 + $0x30] sm:$0xff] }
  0x57   : > { %564 = vmatmul.f32.gmra.mxu1 %v3620_v37  ;;  %966 = vmatpush.msra.mxu3 %v965_v50 }
  0x58   : > { %828 = vmatpush.msrb.mxu1 %v3501_v17  ;;  %867 = vmatpush.msra.mxu2 %v3659_v0  ;;  %v993_v17 = vand.u32 4294901760, %v3768_v11 }
  0x59   : > { %463 = vmatmul.f32.gmra.mxu0 %v462_v22  ;;  %972 = vmatpush.msra.mxu3 %v971_v28  ;;  %v3826_v28 = vsub.f32 %v312_v38, %v3811_v46  ;;  %v309_v38 = vld [vmem:[%s5682_s2 + $0x20] sm:$0xff] }
  0x5a   : > { %773 = vmatpush.msrb.mxu0 %v551_v57  ;;  %830 = vmatpush.msrb.mxu1 %v3507_v19  ;;  %v994_v4 = vsub.f32 %v3768_v11, %v993_v17  ;;  %v3788_v19 = vsub.f32 %v314_v23, %v3773_v44  ;;  %v313_v57 = vld [vmem:[%s5682_s2 + $0x40] sm:$0xff]  ;;  %v3832_v23 = vand.u32 4294901760, %v311_v10 }
  0x5b   : > { %869 = vmatpush.msra.mxu2 %v3683_v31  ;;  %978 = vmatpush.msra.mxu3 %v977_v1  ;;  %v3794_v33 = vand.u32 4294901760, %v313_v57  ;;  %v310_v1 = vld [vmem:[%s5682_s2 + $0x28] sm:$0xff] }
  0x5c   : > { %1092 = vmatpush.msra.mxu0 %v3668_v2  ;;  %1180 = vmatpush.msra.mxu1 %v3642_v52  ;;  %v995_v39 = vand.u32 4294901760, %v994_v4  ;;  %v999_v40 = vand.u32 4294901760, %v3788_v19 }
  0x5d   : > { %584 = vmatmul.f32.gmra.mxu3 %v3626_v43  ;;  %622 = vmatmul.f32.vlgmr.msrb.gmra.mxu2 %v3587_v61  ;;  %v3805_v27 = vsub.f32 %v313_v57, %v3794_v33  ;;  %v1011_v61 = vand.u32 4294901760, %v3826_v28 }
  0x5e   : > { %871 = vmatpush.msra.mxu2 %v3708_v5  ;;  %984 = vmatpush.msra.mxu3 %v983_v16  ;;  %v1000_v45 = vsub.f32 %v3788_v19, %v999_v40  ;;  %v3849_v16 = vand.u32 4294901760, %v310_v1 }
  0x5f   : > { %568 = vmatmul.f32.gmra.mxu1 %v3648_v56  ;;  %1095 = vmatpush.msra.mxu0 %v3681_v24  ;;  %v1005_v50 = vand.u32 4294901760, %v3805_v27  ;;  %v1012_v30 = vsub.f32 %v3826_v28, %v1011_v61 }
  0x60   : > { %873 = vmatpush.msra.mxu2 %v3731_v47  ;;  %1182 = vmatpush.msra.mxu1 %v3659_v0  ;;  %v1001_v58 = vand.u32 4294901760, %v1000_v45  ;;  %v3864_v57 = vsub.f32 %v310_v1, %v3849_v16 }
  0x61   : > { %775 = vmatmul.f32.vlgmr.msrb.gmra.mxu0 %v3575_v54  ;;  %990 = vmatpush.msra.mxu3 %v989_v48  ;;  %v1006_v22 = vsub.f32 %v3805_v27, %v1005_v50  ;;  %v1013_v4 = vand.u32 4294901760, %v1012_v30 }
  0x62   : > { %1098 = vmatpush.msra.mxu0 %v3700_v25  ;;  %875 = vmatpush.msra.mxu2 %v3758_v36 }
  0x63   : > { %1184 = vmatpush.msra.mxu1 %v3683_v31  ;;  %996 = vmatpush.msra.mxu3 %v995_v39  ;;  %v1007_v29 = vand.u32 4294901760, %v1006_v22  ;;  %v308_v39 = vld [vmem:[%s5682_s2 + $0x18] sm:$0xff] }
  0x64   : > { %1101 = vmatpush.msra.mxu0 %v3722_v20  ;;  %877 = vmatpush.msra.mxu2 %v3773_v44  ;;  %v3882_v22 = vand.u32 4294901760, %v308_v39 }
  0x65   : > { %627 = vmatmul.f32.gmra.mxu2 %v3603_v12  ;;  %688 = vmatmul.f32.vlgmr.msrb.gmra.mxu3 %v436_v8  ;;  %v3843_v8 = vsub.f32 %v311_v10, %v3832_v23  ;;  %v1023_v12 = vand.u32 4294901760, %v3864_v57 }
  0x66   : > { %1186 = vmatpush.msra.mxu1 %v3708_v5  ;;  %1002 = vmatpush.msra.mxu3 %v1001_v58  ;;  %v3873_v58 = vand.u32 4294901760, %v309_v38  ;;  %v3902_v30 = vsub.f32 %v308_v39, %v3882_v22 }
  0x67   : > { %832 = vmatmul.f32.vlgmr.msrb.gmra.mxu1 %v3575_v54  ;;  %1104 = vmatpush.msra.mxu0 %v3747_v59  ;;  %v1017_v54 = vand.u32 4294901760, %v3843_v8  ;;  %v281_v59 = vld [vmem:[%s3439_s9 + $0x40] sm:$0xff] }
  0x68   : > { %879 = vmatpush.msra.mxu2 %v3794_v33  ;;  %1188 = vmatpush.msra.mxu1 %v3731_v47  ;;  %v5687_v39 = vand.u32 4294901760, %v3902_v30 }
  0x69   : > { %779 = vmatmul.f32.gmra.mxu0 %v3591_v63  ;;  %1008 = vmatpush.msra.mxu3 %v1007_v29  ;;  %v1018_v48 = vsub.f32 %v3843_v8, %v1017_v54 }
  0x6a   : > { %1107 = vmatpush.msra.mxu0 %v3768_v11  ;;  %881 = vmatpush.msra.mxu2 %v3811_v46 }
  0x6b   : > { %1190 = vmatpush.msra.mxu1 %v3758_v36  ;;  %1014 = vmatpush.msra.mxu3 %v1013_v4  ;;  %v1019_v45 = vand.u32 4294901760, %v1018_v48  ;;  %v307_v4 = vld [vmem:[%s5682_s2 + $0x10] sm:$0xff]  ;;  %v306_v48 = vld [vmem:[%s5682_s2 + $0x8] sm:$0xff] }
  0x6c   : > { %1110 = vmatpush.msra.mxu0 %v3788_v19  ;;  %883 = vmatpush.msra.mxu2 %v3832_v23 }
  0x6d   : > { %632 = vmatmul.f32.gmra.mxu2 %v3637_v51  ;;  %694 = vmatmul.f32.gmra.mxu3 %v444_v35  ;;  %v3880_v35 = vsub.f32 %v309_v38, %v3873_v58  ;;  %v305_v38 = vld [vmem:[%s5682_s2] sm:$0xff]  ;;  %v3914_v51 = vand.u32 4294901760, %v307_v4 }
  0x6e   : > { %1192 = vmatpush.msra.mxu1 %v3773_v44  ;;  %1113 = vmatpush.msra.mxu0 %v3805_v27 }
  0x6f   : > { %836 = vmatmul.f32.gmra.mxu1 %v3591_v63  ;;  %1020 = vmatpush.msra.mxu3 %v1019_v45  ;;  %v1024_v63 = vsub.f32 %v3864_v57, %v1023_v12  ;;  %v5686_v10 = vand.u32 4294901760, %v3880_v35 }
  0x70   : > { %885 = vmatpush.msra.mxu2 %v3849_v16  ;;  %1194 = vmatpush.msra.mxu1 %v3794_v33 }
  0x71   : > { %783 = vmatmul.f32.gmra.mxu0 %v3620_v37  ;;  %v1025_v29 = vand.u32 4294901760, %v1024_v63  ;;  %v1030_v1 = vsub.f32 %v3880_v35, %v5686_v10  ;;  %v3923_v63 = vsub.f32 %v307_v4, %v3914_v51 }
  0x72   : > { %1116 = vmatpush.msra.mxu0 %v3826_v28  ;;  %887 = vmatpush.msra.mxu2 %v3873_v58 }
  0x73   : > { %1196 = vmatpush.msra.mxu1 %v3811_v46  ;;  %1026 = vmatpush.msra.mxu3 %v1025_v29  ;;  %v1031_v45 = vand.u32 4294901760, %v1030_v1  ;;  %v3925_v29 = vand.u32 4294901760, %v305_v38  ;;  %v1036_v1 = vsub.f32 %v3902_v30, %v5687_v39 }
  0x74   : > { %1119 = vmatpush.msra.mxu0 %v3843_v8  ;;  %889 = vmatpush.msra.mxu2 %v3882_v22  ;;  %v285_v8 = vld [vmem:[%s3439_s9 + $0x60] sm:$0xff] }
  0x75   : > { %637 = vmatmul.f32.gmra.mxu2 %v3674_v13  ;;  %700 = vmatmul.f32.gmra.mxu3 %v452_v15  ;;  %v3916_v15 = vand.u32 4294901760, %v306_v48  ;;  %v1037_v4 = vand.u32 4294901760, %v1036_v1  ;;  %v3946_v6 = vsub.f32 %v305_v38, %v3925_v29 }
  0x76   : > { %1198 = vmatpush.msra.mxu1 %v3832_v23  ;;  %1122 = vmatpush.msra.mxu0 %v3864_v57 }
  0x77   : > { %840 = vmatmul.f32.gmra.mxu1 %v3620_v37  ;;  %1032 = vmatpush.msra.mxu3 %v1031_v45  ;;  %v5689_v37 = vand.u32 4294901760, %v3923_v63  ;;  %v3936_v45 = vsub.f32 %v306_v48, %v3916_v15 }
  0x78   : > { %891 = vmatpush.msra.mxu2 %v3914_v51  ;;  %1200 = vmatpush.msra.mxu1 %v3849_v16 }
  0x79   : > { %787 = vmatmul.f32.gmra.mxu0 %v3648_v56  ;;  %v1042_v10 = vsub.f32 %v3923_v63, %v5689_v37  ;;  %v1047_v39 = vand.u32 4294901760, %v3936_v45  ;;  %1038 = vmatpush.msra.mxu3 %v1037_v4  ;;  %v1053_v37 = vand.u32 4294901760, %v3946_v6  ;;  %v331_v4 = vld [vmem:[%s5682_s2 + $0xd0] sm:$0xff] }
  0x7a   : > { %1125 = vmatpush.msra.mxu0 %v3880_v35  ;;  %893 = vmatpush.msra.mxu2 %v3916_v15 }
  0x7b   : > { %1202 = vmatpush.msra.mxu1 %v3873_v58  ;;  %v1043_v48 = vand.u32 4294901760, %v1042_v10  ;;  %v1048_v1 = vsub.f32 %v3936_v45, %v1047_v39  ;;  %v1054_v13 = vsub.f32 %v3946_v6, %v1053_v37 }
  0x7c   : > { %895 = vmatpush.msra.mxu2 %v3925_v29  ;;  %1128 = vmatpush.msra.mxu0 %v3902_v30 }
  0x7d   : > { %642 = vmatmul.f32.gmra.mxu2 %v3542_v34  ;;  %706 = vmatmul.f32.gmra.mxu3 %v460_v32  ;;  %v1049_v38 = vand.u32 4294901760, %v1048_v1  ;;  %v1055_v32 = vand.u32 4294901760, %v1054_v13  ;;  %v336_v34 = vld [vmem:[%s5682_s2 + $0xf8] sm:$0xff] }
  0x7e   : > { %1204 = vmatpush.msra.mxu1 %v3882_v22  ;;  %1131 = vmatpush.msra.mxu0 %v3923_v63 }
  0x7f   : > { %844 = vmatmul.f32.gmra.mxu1 %v3648_v56  ;;  %1044 = vmatpush.msra.mxu3 %v1043_v48  ;;  %v273_v56 = vld [vmem:[%s3439_s9] sm:$0xff] }
  0x80   : > { %1206 = vmatpush.msra.mxu1 %v3914_v51  ;;  %1263 = vmatpush.msrb.mxu2 %v963_v3  ;;  %v3981_v2 = vand.u32 4294901760, %v273_v56 }
  0x81   : > { %791 = vmatmul.f32.gmra.mxu0 %v3520_v26  ;;  %1050 = vmatpush.msra.mxu3 %v1049_v38  ;;  %v5744_v38 = vand.u32 4294901760, %v3902_v30 }
  0x82   : > { %1134 = vmatpush.msra.mxu0 %v3936_v45  ;;  %1208 = vmatpush.msra.mxu1 %v3916_v15  ;;  %v329_v45 = vld [vmem:[%s5682_s2 + $0xc0] sm:$0xff] }
  0x83   : > { %1267 = vmatpush.msrb.mxu2 %v969_v18  ;;  %1056 = vmatpush.msra.mxu3 %v1055_v32 }
  0x84   : > { %1137 = vmatpush.msra.mxu0 %v3946_v6  ;;  %1210 = vmatpush.msra.mxu1 %v3925_v29 }
  0x85   : > { %647 = vmatmul.f32.gmra.mxu2 %v3583_v60  ;;  %712 = vmatmul.f32.gmra.mxu3 %v468_v41  ;;  %v335_v41 = vld [vmem:[%s5682_s2 + $0xf0] sm:$0xff] }
  0x86   : > { %1358 = vmatpush.msrb.mxu3 %v3642_v52  ;;  %1271 = vmatpush.msrb.mxu2 %v975_v42  ;;  %v277_v52 = vld [vmem:[%s3439_s9 + $0x20] sm:$0xff]  ;;  %v4004_v24 = vand.u32 4294901760, %v335_v41 }
  0x87   : > { %848 = vmatmul.f32.gmra.mxu1 %v3520_v26  ;;  %v3993_v26 = vsub.f32 %v273_v56, %v3981_v2  ;;  %v4020_v3 = vand.u32 4294901760, %v277_v52  ;;  %v5745_v56 = vand.u32 4294901760, %v3923_v63 }
  0x88   : > { %1360 = vmatpush.msrb.mxu3 %v3659_v0  ;;  %1275 = vmatpush.msrb.mxu2 %v981_v9  ;;  %v4002_v0 = vand.u32 4294901760, %v336_v34  ;;  %v333_v9 = vld [vmem:[%s5682_s2 + $0xe0] sm:$0xff] }
  0x89   : > { %795 = vmatmul.f32.gmra.mxu0 %v3572_v53  ;;  %v4044_v20 = vsub.f32 %v277_v52, %v4020_v3 }
  0x8a   : > { %1362 = vmatpush.msrb.mxu3 %v3683_v31  ;;  %1279 = vmatpush.msrb.mxu2 %v987_v14  ;;  %v4012_v60 = vsub.f32 %v336_v34, %v4002_v0  ;;  %v898_v31 = vand.u32 4294901760, %v3993_v26 }
  0x8b   : > { %1423 = vmatpush.msrb.mxu0 %v4002_v0  ;;  %v906_v19 = vand.u32 4294901760, %v4044_v20 }
  0x8c   : > { %1364 = vmatpush.msrb.mxu3 %v3708_v5  ;;  %1283 = vmatpush.msrb.mxu2 %v993_v17  ;;  %v899_v42 = vsub.f32 %v3993_v26, %v898_v31 }
  0x8d   : > { %652 = vmatmul.f32.gmra.mxu2 %v3610_v21  ;;  %718 = vmatmul.f32.gmra.mxu3 %v476_v7  ;;  %v4015_v7 = vsub.f32 %v335_v41, %v4004_v24  ;;  %v907_v28 = vsub.f32 %v4044_v20, %v906_v19  ;;  %v289_v41 = vld [vmem:[%s3439_s9 + $0x80] sm:$0xff] }
  0x8e   : > { %1366 = vmatpush.msrb.mxu3 %v3731_v47  ;;  %1287 = vmatpush.msrb.mxu2 %v999_v40  ;;  %v334_v47 = vld [vmem:[%s5682_s2 + $0xe8] sm:$0xff]  ;;  %v900_v17 = vand.u32 4294901760, %v899_v42 }
  0x8f   : > { %852 = vmatmul.f32.gmra.mxu1 %v3572_v53  ;;  %v1521_v53 = vand.u32 4294901760, %v4012_v60  ;;  %1425 = vmatpush.msrb.mxu0 %v4004_v24  ;;  %v1527_v18 = vand.u32 4294901760, %v4015_v7  ;;  %v4053_v21 = vand.u32 4294901760, %v334_v47  ;;  %v908_v48 = vand.u32 4294901760, %v907_v28 }
  0x90   : > { %1368 = vmatpush.msrb.mxu3 %v3758_v36  ;;  %1291 = vmatpush.msrb.mxu2 %v1005_v50  ;;  %v5742_v50 = vand.u32 4294901760, %v3646_v55 }
  0x91   : > { %799 = vmatmul.f32.gmra.mxu0 %v3589_v62  ;;  %v1522_v25 = vsub.f32 %v4012_v60, %v1521_v53  ;;  %v1528_v5 = vsub.f32 %v4015_v7, %v1527_v18  ;;  %v4063_v11 = vsub.f32 %v334_v47, %v4053_v21 }
  0x92   : > { %1370 = vmatpush.msrb.mxu3 %v3773_v44  ;;  %1295 = vmatpush.msrb.mxu2 %v1011_v61  ;;  %v332_v61 = vld [vmem:[%s5682_s2 + $0xd8] sm:$0xff] }
  0x93   : > { %v1523_v36 = vand.u32 4294901760, %v1522_v25  ;;  %v1529_v14 = vand.u32 4294901760, %v1528_v5  ;;  %1427 = vmatpush.msrb.mxu0 %v4053_v21 }
  0x94   : > { %1372 = vmatpush.msrb.mxu3 %v3794_v33  ;;  %v4070_v33 = vand.u32 4294901760, %v281_v59  ;;  %1299 = vmatpush.msrb.mxu2 %v1017_v54 }
  0x95   : > { %657 = vmatmul.f32.gmra.mxu2 %v3646_v55  ;;  %724 = vmatmul.f32.gmra.mxu3 %v484_v49  ;;  %v4055_v49 = vand.u32 4294901760, %v333_v9  ;;  %v5743_v55 = vand.u32 4294901760, %v3880_v35  ;;  %v4115_v35 = vand.u32 4294901760, %v331_v4 }
  0x96   : > { %1374 = vmatpush.msrb.mxu3 %v3811_v46  ;;  %1524 = vmatpush.msrb.mxu1 %v1523_v36  ;;  %v293_v36 = vld [vmem:[%s3439_s9 + $0xa0] sm:$0xff] }
  0x97   : > { %856 = vmatmul.f32.gmra.mxu1 %v3589_v62  ;;  %v4066_v44 = vsub.f32 %v333_v9, %v4055_v49  ;;  %v1533_v62 = vand.u32 4294901760, %v4063_v11  ;;  %1429 = vmatpush.msrb.mxu0 %v4055_v49  ;;  %v4123_v13 = vsub.f32 %v331_v4, %v4115_v35 }
  0x98   : > { %1530 = vmatpush.msrb.mxu1 %v1529_v14  ;;  %1376 = vmatpush.msrb.mxu3 %v3832_v23  ;;  %v4092_v23 = vsub.f32 %v281_v59, %v4070_v33 }
  0x99   : > { %803 = vmatmul.f32.gmra.mxu0 %v3626_v43  ;;  %v1539_v40 = vand.u32 4294901760, %v4066_v44  ;;  %1303 = vmatpush.msrb.mxu2 %v1023_v12  ;;  %v1534_v27 = vsub.f32 %v4063_v11, %v1533_v62  ;;  %v4098_v12 = vand.u32 4294901760, %v332_v61  ;;  %v5697_v34 = vand.u32 4294901760, %v4123_v13 }
  0x9a   : > { %1378 = vmatpush.msrb.mxu3 %v3849_v16  ;;  %v914_v1 = vand.u32 4294901760, %v4092_v23  ;;  %v4113_v16 = vand.u32 4294901760, %v285_v8 }
  0x9b   : > { %v1540_v46 = vsub.f32 %v4066_v44, %v1539_v40  ;;  %v1535_v54 = vand.u32 4294901760, %v1534_v27  ;;  %1307 = vmatpush.msrb.mxu2 %v5743_v55  ;;  %1431 = vmatpush.msrb.mxu0 %v4098_v12  ;;  %v4106_v10 = vsub.f32 %v332_v61, %v4098_v12  ;;  %v1552_v25 = vsub.f32 %v4123_v13, %v5697_v34 }
  0x9c   : > { %1380 = vmatpush.msrb.mxu3 %v3873_v58  ;;  %v915_v58 = vsub.f32 %v4092_v23, %v914_v1  ;;  %v4136_v30 = vsub.f32 %v285_v8, %v4113_v16  ;;  %v4206_v61 = vand.u32 4294901760, %v293_v36 }
  0x9d   : > { %730 = vmatmul.f32.gmra.mxu3 %v5742_v50  ;;  %901 = vmatmul.f32.vlgmr.msra.gmra.mxu2 %v900_v17  ;;  %v1541_v57 = vand.u32 4294901760, %v1540_v46 }
  0x9e   : > { %1536 = vmatpush.msrb.mxu1 %v1535_v54  ;;  %1311 = vmatpush.msrb.mxu2 %v5744_v38  ;;  %v916_v42 = vand.u32 4294901760, %v915_v58  ;;  %v922_v47 = vand.u32 4294901760, %v4136_v30  ;;  %v326_v38 = vld [vmem:[%s5682_s2 + $0xa8] sm:$0xff] }
  0x9f   : > { %860 = vmatmul.f32.gmra.mxu1 %v3626_v43  ;;  %v5700_v43 = vand.u32 4294901760, %v4106_v10  ;;  %1433 = vmatpush.msrb.mxu0 %v4115_v35 }
  0xa0   : > { %1542 = vmatpush.msrb.mxu1 %v1541_v57  ;;  %1382 = vmatpush.msrb.mxu3 %v3882_v22  ;;  %v330_v22 = vld [vmem:[%s5682_s2 + $0xc8] sm:$0xff]  ;;  %v923_v6 = vsub.f32 %v4136_v30, %v922_v47 }
  0xa1   : > { %1140 = vmatmul.f32.vlgmr.msra.gmra.mxu0 %v3993_v26  ;;  %v1546_v32 = vsub.f32 %v4106_v10, %v5700_v43  ;;  %1315 = vmatpush.msrb.mxu2 %v5745_v56  ;;  %v4143_v63 = vand.u32 4294901760, %v330_v22 }
  0xa2   : > { %1384 = vmatpush.msrb.mxu3 %v3914_v51  ;;  %v4159_v51 = vand.u32 4294901760, %v289_v41  ;;  %v924_v50 = vand.u32 4294901760, %v923_v6 }
  0xa3   : > { %v1547_v52 = vand.u32 4294901760, %v1546_v32  ;;  %1319 = vmatpush.msrb.mxu2 %v1047_v39  ;;  %1435 = vmatpush.msrb.mxu0 %v4143_v63  ;;  %v4155_v5 = vsub.f32 %v330_v22, %v4143_v63  ;;  %v1553_v39 = vand.u32 4294901760, %v1552_v25  ;;  %v297_v32 = vld [vmem:[%s3439_s9 + $0xc0] sm:$0xff]  ;;  %v4236_v22 = vand.u32 4294901760, %v326_v38 }
  0xa4   : > { %1386 = vmatpush.msrb.mxu3 %v3916_v15  ;;  %v4184_v15 = vsub.f32 %v289_v41, %v4159_v51 }
  0xa5   : > { %909 = vmatmul.f32.gmra.mxu2 %v908_v48  ;;  %1058 = vmatmul.f32.vlgmr.msra.gmra.mxu3 %v3981_v2  ;;  %v5696_v26 = vand.u32 4294901760, %v4155_v5  ;;  %v4229_v48 = vsub.f32 %v293_v36, %v4206_v61 }
  0xa6   : > { %1548 = vmatpush.msrb.mxu1 %v1547_v52  ;;  %1323 = vmatpush.msrb.mxu2 %v1053_v37  ;;  %v328_v37 = vld [vmem:[%s5682_s2 + $0xb8] sm:$0xff]  ;;  %v930_v28 = vand.u32 4294901760, %v4184_v15  ;;  %v4247_v52 = vsub.f32 %v326_v38, %v4236_v22  ;;  %v323_v38 = vld [vmem:[%s5682_s2 + $0x90] sm:$0xff] }
  0xa7   : > { %1214 = vmatmul.f32.vlgmr.msra.gmra.mxu1 %v898_v31  ;;  %v4167_v31 = vand.u32 4294901760, %v329_v45  ;;  %v1558_v9 = vsub.f32 %v4155_v5, %v5696_v26  ;;  %1388 = vmatpush.msrb.mxu3 %v3925_v29  ;;  %v4191_v27 = vand.u32 4294901760, %v328_v37 }
  0xa8   : > { %1650 = vmatpush.msra.mxu2 %v4012_v60  ;;  %1554 = vmatpush.msrb.mxu1 %v1553_v39  ;;  %v931_v4 = vsub.f32 %v4184_v15, %v930_v28  ;;  %v4251_v39 = vand.u32 4294901760, %v297_v32 }
  0xa9   : > { %1145 = vmatmul.f32.gmra.mxu0 %v4044_v20  ;;  %v4176_v59 = vsub.f32 %v329_v45, %v4167_v31  ;;  %v1559_v14 = vand.u32 4294901760, %v1558_v9  ;;  %1738 = vmatpush.msra.mxu3 %v4002_v0  ;;  %v4202_v46 = vsub.f32 %v328_v37, %v4191_v27  ;;  %v327_v20 = vld [vmem:[%s5682_s2 + $0xb0] sm:$0xff]  ;;  %v5691_v45 = vand.u32 4294901760, %v4247_v52 }
  0xaa   : > { %1437 = vmatpush.msrb.mxu0 %v4167_v31  ;;  %1653 = vmatpush.msra.mxu2 %v4015_v7  ;;  %v4213_v54 = vand.u32 4294901760, %v327_v20  ;;  %v932_v25 = vand.u32 4294901760, %v931_v4 }
  0xab   : > { %v5694_v17 = vand.u32 4294901760, %v4176_v59  ;;  %1560 = vmatpush.msrb.mxu1 %v1559_v14  ;;  %1740 = vmatpush.msra.mxu3 %v4004_v24  ;;  %v5693_v8 = vand.u32 4294901760, %v4202_v46  ;;  %v1582_v6 = vsub.f32 %v4247_v52, %v5691_v45  ;;  %v4274_v14 = vsub.f32 %v297_v32, %v4251_v39 }
  0xac   : > { %1439 = vmatpush.msrb.mxu0 %v4191_v27  ;;  %1656 = vmatpush.msra.mxu2 %v4063_v11  ;;  %v4222_v55 = vsub.f32 %v327_v20, %v4213_v54  ;;  %v301_v20 = vld [vmem:[%s3439_s9 + $0xe0] sm:$0xff] }
  0xad   : > { %917 = vmatmul.f32.gmra.mxu2 %v916_v42  ;;  %1062 = vmatmul.f32.gmra.mxu3 %v4020_v3  ;;  %v1564_v29 = vsub.f32 %v4176_v59, %v5694_v17  ;;  %v1570_v57 = vsub.f32 %v4202_v46, %v5693_v8  ;;  %v938_v42 = vand.u32 4294901760, %v4229_v48 }
  0xae   : > { %1742 = vmatpush.msra.mxu3 %v4053_v21  ;;  %1441 = vmatpush.msrb.mxu0 %v4213_v54  ;;  %v5692_v58 = vand.u32 4294901760, %v4222_v55 }
  0xaf   : > { %1220 = vmatmul.f32.gmra.mxu1 %v906_v19  ;;  %v1565_v19 = vand.u32 4294901760, %v1564_v29  ;;  %v1571_v56 = vand.u32 4294901760, %v1570_v57  ;;  %1659 = vmatpush.msra.mxu2 %v4066_v44  ;;  %v939_v36 = vsub.f32 %v4229_v48, %v938_v42  ;;  %v324_v29 = vld [vmem:[%s5682_s2 + $0x98] sm:$0xff] }
  0xb0   : > { %1744 = vmatpush.msra.mxu3 %v4055_v49  ;;  %v1576_v41 = vsub.f32 %v4222_v55, %v5692_v58  ;;  %1443 = vmatpush.msrb.mxu0 %v4236_v22  ;;  %v4283_v4 = vand.u32 4294901760, %v324_v29 }
  0xb1   : > { %1150 = vmatmul.f32.gmra.mxu0 %v4092_v23  ;;  %1566 = vmatpush.msrb.mxu1 %v1565_v19  ;;  %v325_v23 = vld [vmem:[%s5682_s2 + $0xa0] sm:$0xff]  ;;  %v1583_v19 = vand.u32 4294901760, %v1582_v6 }
  0xb2   : > { %1662 = vmatpush.msra.mxu2 %v4106_v10  ;;  %v4258_v9 = vand.u32 4294901760, %v325_v23  ;;  %1746 = vmatpush.msra.mxu3 %v4098_v12 }
  0xb3   : > { %1572 = vmatpush.msrb.mxu1 %v1571_v56 }
  0xb4   : > { %1665 = vmatpush.msra.mxu2 %v4123_v13  ;;  %1445 = vmatpush.msrb.mxu0 %v4258_v9  ;;  %v4267_v37 = vsub.f32 %v325_v23, %v4258_v9  ;;  %v940_v23 = vand.u32 4294901760, %v939_v36 }
  0xb5   : > { %925 = vmatmul.f32.gmra.mxu2 %v924_v50  ;;  %1066 = vmatmul.f32.gmra.mxu3 %v4070_v33 }
  0xb6   : > { %v5690_v57 = vand.u32 4294901760, %v4267_v37  ;;  %1748 = vmatpush.msra.mxu3 %v4115_v35  ;;  %1668 = vmatpush.msra.mxu2 %v4155_v5 }
  0xb7   : > { %1226 = vmatmul.f32.gmra.mxu1 %v914_v1  ;;  %v1577_v1 = vand.u32 4294901760, %v1576_v41  ;;  %1447 = vmatpush.msrb.mxu0 %v4283_v4  ;;  %v4297_v41 = vsub.f32 %v324_v29, %v4283_v4 }
  0xb8   : > { %v1588_v56 = vsub.f32 %v4267_v37, %v5690_v57  ;;  %1750 = vmatpush.msra.mxu3 %v4143_v63  ;;  %1671 = vmatpush.msra.mxu2 %v4176_v59  ;;  %v321_v57 = vld [vmem:[%s5682_s2 + $0x80] sm:$0xff] }
  0xb9   : > { %1155 = vmatmul.f32.gmra.mxu0 %v4136_v30  ;;  %1578 = vmatpush.msrb.mxu1 %v1577_v1  ;;  %v5699_v30 = vand.u32 4294901760, %v4274_v14  ;;  %v322_v1 = vld [vmem:[%s5682_s2 + $0x88] sm:$0xff]  ;;  %v4331_v8 = vand.u32 4294901760, %v321_v57 }
  0xba   : > { %v1589_v6 = vand.u32 4294901760, %v1588_v56  ;;  %v4314_v36 = vand.u32 4294901760, %v322_v1  ;;  %1752 = vmatpush.msra.mxu3 %v4167_v31  ;;  %1674 = vmatpush.msra.mxu2 %v4202_v46 }
  0xbb   : > { %1584 = vmatpush.msrb.mxu1 %v1583_v19  ;;  %v5695_v19 = vand.u32 4294901760, %v4297_v41 }
  0xbc   : > { %v4329_v58 = vsub.f32 %v322_v1, %v4314_v36  ;;  %1754 = vmatpush.msra.mxu3 %v4191_v27  ;;  %1677 = vmatpush.msra.mxu2 %v4222_v55 }
  0xbd   : > { %933 = vmatmul.f32.gmra.mxu2 %v932_v25  ;;  %1070 = vmatmul.f32.gmra.mxu3 %v4113_v16  ;;  %v4299_v25 = vand.u32 4294901760, %v323_v38  ;;  %v1594_v56 = vsub.f32 %v4297_v41, %v5695_v19 }
  0xbe   : > { %v4279_v50 = vpop.f32.mrf.mxu0  ;;  %1590 = vmatpush.msrb.mxu1 %v1589_v6  ;;  %v947_v6 = vsub.f32 %v4274_v14, %v5699_v30  ;;  %v1605_v34 = vand.u32 4294901760, %v4329_v58  ;;  %1756 = vmatpush.msra.mxu3 %v4213_v54 }
  0xbf   : > { %1232 = vmatmul.f32.gmra.mxu1 %v922_v47  ;;  %v4303_v47 = vand.u32 4294901760, %v301_v20  ;;  %1449 = vmatpush.msrb.mxu0 %v4299_v25  ;;  %v4312_v29 = vsub.f32 %v323_v38, %v4299_v25  ;;  %v1595_v26 = vand.u32 4294901760, %v1594_v56 }
  0xc0   : > { %v472_v32 = vpop.f32.mrf.mxu2  ;;  %v1606_v30 = vsub.f32 %v4329_v58, %v1605_v34  ;;  %1680 = vmatpush.msra.mxu2 %v4247_v52  ;;  %1758 = vmatpush.msra.mxu3 %v4236_v22 }
  0xc1   : > { %1160 = vmatmul.f32.gmra.mxu0 %v4184_v15  ;;  %v5698_v38 = vand.u32 4294901760, %v4312_v29  ;;  %v4338_v17 = vsub.f32 %v301_v20, %v4303_v47  ;;  %1596 = vmatpush.msrb.mxu1 %v1595_v26  ;;  %v948_v15 = vand.u32 4294901760, %v947_v6  ;;  %v274_v26 = vld [vmem:[%s3439_s9 + $0x8] sm:$0xff] }
  0xc2   : > { %1451 = vmatpush.msrb.mxu0 %v4314_v36  ;;  %v1607_v60 = vand.u32 4294901760, %v1606_v30  ;;  %v4381_v7 = vand.u32 4294901760, %v274_v26  ;;  %1683 = vmatpush.msra.mxu2 %v4267_v37 }
  0xc3   : > { %v1600_v1 = vsub.f32 %v4312_v29, %v5698_v38  ;;  %1760 = vmatpush.msra.mxu3 %v4258_v9 }
  0xc4   : > { %v4321_v45 = vpop.f32.mrf.mxu1  ;;  %1453 = vmatpush.msrb.mxu0 %v4331_v8  ;;  %v4397_v44 = vsub.f32 %v274_v26, %v4381_v7  ;;  %1686 = vmatpush.msra.mxu2 %v4297_v41  ;;  %v5753_v26 = vand.u32 4294901760, %v4247_v52 }
  0xc5   : > { %941 = vmatmul.f32.gmra.mxu2 %v940_v23  ;;  %1074 = vmatmul.f32.gmra.mxu3 %v4159_v51  ;;  %v4348_v23 = vsub.f32 %v321_v57, %v4331_v8  ;;  %v1601_v38 = vand.u32 4294901760, %v1600_v1 }
  0xc6   : > { %v4340_v19 = vpop.f32.mrf.mxu0  ;;  %1821 = vmatpush.msra.mxu0 %v1521_v53  ;;  %1762 = vmatpush.msra.mxu3 %v4283_v4 }
  0xc7   : > { %1238 = vmatmul.f32.gmra.mxu1 %v930_v28  ;;  %v1611_v57 = vand.u32 4294901760, %v4348_v23  ;;  %v954_v28 = vand.u32 4294901760, %v4338_v17  ;;  %1689 = vmatpush.msra.mxu2 %v4312_v29 }
  0xc8   : > { %v480_v20 = vpop.f32.mrf.mxu2  ;;  %v573_v56 = vpop.f32.mrf.mxu3  ;;  %1602 = vmatpush.msrb.mxu1 %v1601_v38  ;;  %1825 = vmatpush.msra.mxu0 %v1527_v18  ;;  %v5746_v38 = vand.u32 4294901760, %v4106_v10  ;;  %v5748_v10 = vand.u32 4294901760, %v4155_v5 }
  0xc9   : > { %v4360_v43 = vadd.f32 %v573_v56, %v472_v32  ;;  %1165 = vmatmul.f32.gmra.mxu0 %v4229_v48  ;;  %v1612_v53 = vsub.f32 %v4348_v23, %v1611_v57  ;;  %v955_v30 = vsub.f32 %v4338_v17, %v954_v28  ;;  %v5747_v48 = vand.u32 4294901760, %v4123_v13  ;;  %1764 = vmatpush.msra.mxu3 %v4299_v25 }
  0xca   : > { %1608 = vmatpush.msrb.mxu1 %v1607_v60  ;;  %1829 = vmatpush.msra.mxu0 %v1533_v62  ;;  %v5751_v60 = vand.u32 4294901760, %v4202_v46 }
  0xcb   : > { %v1613_v6 = vand.u32 4294901760, %v1612_v53  ;;  %v956_v56 = vand.u32 4294901760, %v955_v30  ;;  %1692 = vmatpush.msra.mxu2 %v4329_v58  ;;  %1766 = vmatpush.msra.mxu3 %v4314_v36 }
  0xcc   : > { %v4373_v32 = vpop.f32.mrf.mxu1  ;;  %1833 = vmatpush.msra.mxu0 %v1539_v40  ;;  %v278_v40 = vld [vmem:[%s3439_s9 + $0x28] sm:$0xff] }
  0xcd   : > { %949 = vmatmul.f32.gmra.mxu2 %v948_v15  ;;  %1078 = vmatmul.f32.gmra.mxu3 %v4206_v61 }
  0xce   : > { %v4383_v18 = vpop.f32.mrf.mxu0  ;;  %1614 = vmatpush.msrb.mxu1 %v1613_v6  ;;  %1837 = vmatpush.msra.mxu0 %v5746_v38 }
  0xcf   : > { %1244 = vmatmul.f32.gmra.mxu1 %v938_v42  ;;  %v4413_v42 = vand.u32 4294901760, %v278_v40  ;;  %1695 = vmatpush.msra.mxu2 %v4348_v23 }
  0xd0   : > { %v488_v11 = vpop.f32.mrf.mxu2  ;;  %v577_v62 = vpop.f32.mrf.mxu3  ;;  %1916 = vmatpush.msra.mxu1 %v4002_v0  ;;  %1841 = vmatpush.msra.mxu0 %v5747_v48 }
  0xd1   : > { %v4393_v1 = vadd.f32 %v577_v62, %v480_v20  ;;  %1170 = vmatmul.f32.gmra.mxu0 %v4274_v14  ;;  %v5749_v20 = vand.u32 4294901760, %v4176_v59  ;;  %v4433_v59 = vsub.f32 %v278_v40, %v4413_v42  ;;  %1768 = vmatpush.msra.mxu3 %v4331_v8 }
  0xd2   : > { %1918 = vmatpush.msra.mxu1 %v4004_v24  ;;  %1845 = vmatpush.msra.mxu0 %v5748_v10  ;;  %v1456_v24 = vand.u32 4294901760, %v4397_v44 }
  0xd4   : > { %v4406_v0 = vpop.f32.mrf.mxu1  ;;  %1920 = vmatpush.msra.mxu1 %v4053_v21  ;;  %1849 = vmatpush.msra.mxu0 %v5749_v20  ;;  %v5750_v21 = vand.u32 4294901760, %v4274_v14  ;;  %v282_v14 = vld [vmem:[%s3439_s9 + $0x48] sm:$0xff] }
  0xd5   : > { %957 = vmatmul.f32.gmra.mxu2 %v956_v56  ;;  %1082 = vmatmul.f32.gmra.mxu3 %v4251_v39 }
  0xd6   : > { %v4415_v13 = vpop.f32.mrf.mxu0  ;;  %1922 = vmatpush.msra.mxu1 %v4055_v49  ;;  %1853 = vmatpush.msra.mxu0 %v5751_v60  ;;  %v1457_v49 = vsub.f32 %v4397_v44, %v1456_v24 }
  0xd7   : > { %1250 = vmatmul.f32.gmra.mxu1 %v5750_v21 }
  0xd8   : > { %v496_v5 = vpop.f32.mrf.mxu2  ;;  %v581_v15 = vpop.f32.mrf.mxu3  ;;  %1924 = vmatpush.msra.mxu1 %v4098_v12  ;;  %v5752_v12 = vand.u32 4294901760, %v4222_v55  ;;  %v1458_v6 = vand.u32 4294901760, %v1457_v49  ;;  %v4450_v55 = vand.u32 4294901760, %v282_v14 }
  0xd9   : > { %v4426_v53 = vadd.f32 %v581_v15, %v488_v11  ;;  %1175 = vmatmul.f32.gmra.mxu0 %v4338_v17  ;;  %v5754_v11 = vand.u32 4294901760, %v4267_v37  ;;  %v286_v17 = vld [vmem:[%s3439_s9 + $0x68] sm:$0xff] }
  0xda   : > { %1926 = vmatpush.msra.mxu1 %v4115_v35  ;;  %1857 = vmatpush.msra.mxu0 %v5752_v12  ;;  %v1464_v35 = vand.u32 4294901760, %v4433_v59 }
  0xdc   : > { %v4442_v46 = vpop.f32.mrf.mxu1  ;;  %1928 = vmatpush.msra.mxu1 %v4143_v63  ;;  %1861 = vmatpush.msra.mxu0 %v5753_v26  ;;  %v558_v63 = vadd.f32 %v4321_v45, %v4279_v50  ;;  %v1465_v37 = vsub.f32 %v4433_v59, %v1464_v35  ;;  %v4468_v45 = vsub.f32 %v282_v14, %v4450_v55  ;;  %v5755_v50 = vand.u32 4294901760, %v4297_v41  ;;  %v294_v14 = vld [vmem:[%s3439_s9 + $0xa8] sm:$0xff] }
  0xdd   : > { %1086 = vmatmul.f32.gmra.mxu3 %v4303_v47  ;;  %1325 = vmatmul.f32.vlgmr.msrb.gmra.mxu2 %v3981_v2 }
  0xde   : > { %v776_v30 = vpop.f32.mrf.mxu0  ;;  %1930 = vmatpush.msra.mxu1 %v4167_v31  ;;  %1865 = vmatpush.msra.mxu0 %v5754_v11  ;;  %v1466_v56 = vand.u32 4294901760, %v1465_v37  ;;  %v1472_v40 = vand.u32 4294901760, %v4468_v45  ;;  %v570_v11 = vadd.f32 %v4442_v46, %v4415_v13 }
  0xdf   : > { %1256 = vmatmul.f32.gmra.mxu1 %v954_v28  ;;  %v5756_v28 = vand.u32 4294901760, %v4312_v29 }
  0xe0   : > { %v585_v52 = vpop.f32.mrf.mxu3  ;;  %v623_v62 = vpop.f32.mrf.mxu2  ;;  %1932 = vmatpush.msra.mxu1 %v4191_v27  ;;  %1869 = vmatpush.msra.mxu0 %v5755_v50  ;;  %v1473_v58 = vsub.f32 %v4468_v45, %v1472_v40 }
  0xe1   : > { %v4462_v38 = vadd.f32 %v585_v52, %v496_v5  ;;  %v624_v31 = vadd.f32 %v623_v62, %v558_v63  ;;  %1459 = vmatmul.f32.vlgmr.msrb.gmra.mxu0 %v1458_v6  ;;  %v4524_v6 = vand.u32 4294901760, %v294_v14 }
  0xe2   : > { %1934 = vmatpush.msra.mxu1 %v4213_v54  ;;  %1873 = vmatpush.msra.mxu0 %v5756_v28  ;;  %v4481_v54 = vand.u32 4294901760, %v286_v17  ;;  %v1474_v23 = vand.u32 4294901760, %v1473_v58 }
  0xe3   : > { %v4533_v37 = vsub.f32 %v294_v14, %v4524_v6 }
  0xe4   : > { %v833_v27 = vpop.f32.mrf.mxu1  ;;  %1936 = vmatpush.msra.mxu1 %v4236_v22  ;;  %1877 = vmatpush.msra.mxu0 %v1605_v34  ;;  %v562_v22 = vadd.f32 %v4373_v32, %v4340_v19  ;;  %v4496_v34 = vsub.f32 %v286_v17, %v4481_v54  ;;  %v298_v17 = vld [vmem:[%s3439_s9 + $0xc8] sm:$0xff] }
  0xe5   : > { %1329 = vmatmul.f32.gmra.mxu2 %v4020_v3  ;;  %1390 = vmatmul.f32.vlgmr.msrb.gmra.mxu3 %v3981_v2  ;;  %v4536_v28 = vand.u32 4294901760, %v298_v17 }
  0xe6   : > { %v780_v41 = vpop.f32.mrf.mxu0  ;;  %1938 = vmatpush.msra.mxu1 %v4258_v9  ;;  %1881 = vmatpush.msra.mxu0 %v1611_v57  ;;  %v290_v9 = vld [vmem:[%s3439_s9 + $0x88] sm:$0xff]  ;;  %v1480_v57 = vand.u32 4294901760, %v4496_v34 }
  0xe7   : > { %1616 = vmatmul.f32.vlgmr.msrb.gmra.mxu1 %v4381_v7  ;;  %v4506_v20 = vand.u32 4294901760, %v290_v9 }
  0xe8   : > { %v628_v29 = vpop.f32.mrf.mxu2  ;;  %v689_v48 = vpop.f32.mrf.mxu3  ;;  %1940 = vmatpush.msra.mxu1 %v4283_v4 }
  0xe9   : > { %v629_v2 = vadd.f32 %v628_v29, %v562_v22  ;;  %v690_v10 = vadd.f32 %v689_v48, %v624_v31  ;;  %1467 = vmatmul.f32.gmra.mxu0 %v1466_v56  ;;  %v4516_v49 = vsub.f32 %v290_v9, %v4506_v20  ;;  %v5703_v56 = vand.u32 4294901760, %v4533_v37 }
  0xea   : > { %1942 = vmatpush.msra.mxu1 %v4299_v25  ;;  %v566_v25 = vadd.f32 %v4406_v0, %v4383_v18  ;;  %v4545_v48 = vsub.f32 %v298_v17, %v4536_v28 }
  0xeb   : > { %v777_v19 = vadd.f32 %v776_v30, %v690_v10  ;;  %v5713_v0 = vand.u32 4294901760, %v4516_v49  ;;  %v1497_v58 = vsub.f32 %v4533_v37, %v5703_v56 }
  0xec   : > { %v837_v32 = vpop.f32.mrf.mxu1  ;;  %1944 = vmatpush.msra.mxu1 %v4314_v36 }
  0xed   : > { %v4501_v4 = vadd.f32 %v833_v27, %v777_v19  ;;  %1333 = vmatmul.f32.gmra.mxu2 %v4070_v33  ;;  %1394 = vmatmul.f32.gmra.mxu3 %v4020_v3  ;;  %v1481_v3 = vsub.f32 %v4496_v34, %v1480_v57  ;;  %v352_v19 = vld [vmem:[%s5682_s2 + $0x178] sm:$0xff] }
  0xee   : > { %v784_v21 = vpop.f32.mrf.mxu0  ;;  %1946 = vmatpush.msra.mxu1 %v4331_v8 }
  0xef   : > { %1620 = vmatmul.f32.gmra.mxu1 %v4413_v42  ;;  %v1482_v18 = vand.u32 4294901760, %v1481_v3 }
  0xf0   : > { %v633_v36 = vpop.f32.mrf.mxu2  ;;  %v695_v5 = vpop.f32.mrf.mxu3 }
  0xf1   : > { %v634_v15 = vadd.f32 %v633_v36, %v566_v25  ;;  %v696_v60 = vadd.f32 %v695_v5, %v629_v2  ;;  %1475 = vmatmul.f32.gmra.mxu0 %v1474_v23  ;;  %v5702_v23 = vand.u32 4294901760, %v4545_v48  ;;  %v1498_v36 = vand.u32 4294901760, %v1497_v58  ;;  %v351_v5 = vld [vmem:[%s5682_s2 + $0x170] sm:$0xff] }
  0xf2   : > { %v4571_v3 = vand.u32 4294901760, %v351_v5 }
  0xf3   : > { %v781_v12 = vadd.f32 %v780_v41, %v696_v60 }
  0xf4   : > { %v841_v8 = vpop.f32.mrf.mxu1 }
  0xf5   : > { %v4519_v26 = vadd.f32 %v837_v32, %v781_v12  ;;  %1337 = vmatmul.f32.gmra.mxu2 %v4113_v16  ;;  %1398 = vmatmul.f32.gmra.mxu3 %v4070_v33  ;;  %v1489_v33 = vsub.f32 %v4516_v49, %v5713_v0 }
  0xf6   : > { %v788_v30 = vpop.f32.mrf.mxu0 }
  0xf7   : > { %1624 = vmatmul.f32.gmra.mxu1 %v4450_v55  ;;  %v1490_v46 = vand.u32 4294901760, %v1489_v33  ;;  %v350_v33 = vld [vmem:[%s5682_s2 + $0x168] sm:$0xff] }
  0xf8   : > { %v638_v63 = vpop.f32.mrf.mxu2  ;;  %v701_v52 = vpop.f32.mrf.mxu3 }
  0xf9   : > { %v639_v62 = vadd.f32 %v638_v63, %v570_v11  ;;  %v702_v31 = vadd.f32 %v701_v52, %v634_v15  ;;  %1483 = vmatmul.f32.gmra.mxu0 %v1482_v18  ;;  %v4586_v63 = vsub.f32 %v351_v5, %v4571_v3 }
  0xfb   : > { %v785_v50 = vadd.f32 %v784_v21, %v702_v31  ;;  %v4556_v21 = vand.u32 4294901760, %v352_v19  ;;  %v5716_v31 = vand.u32 4294901760, %v4586_v63 }
  0xfc   : > { %v845_v27 = vpop.f32.mrf.mxu1 }
  0xfd   : > { %v4538_v13 = vadd.f32 %v841_v8, %v785_v50  ;;  %1341 = vmatmul.f32.gmra.mxu2 %v4159_v51  ;;  %1402 = vmatmul.f32.gmra.mxu3 %v4113_v16  ;;  %v302_v16 = vld [vmem:[%s3439_s9 + $0xe8] sm:$0xff]  ;;  %v4569_v60 = vsub.f32 %v352_v19, %v4556_v21 }
  0xfe   : > { %v792_v41 = vpop.f32.mrf.mxu0  ;;  %v4558_v25 = vand.u32 4294901760, %v302_v16  ;;  %1981 = vmatpush.msrb.mxu2 %v4556_v21  ;;  %2296 = vmatpush.msrb.mxu1 %v4556_v21 }
  0xff   : > { %1628 = vmatmul.f32.gmra.mxu1 %v4481_v54  ;;  %v2079_v18 = vand.u32 4294901760, %v4569_v60  ;;  %2208 = vmatpush.msrb.mxu0 %v4569_v60 }
 0x100   : > { %v643_v22 = vpop.f32.mrf.mxu2  ;;  %v707_v29 = vpop.f32.mrf.mxu3  ;;  %v4579_v8 = vsub.f32 %v302_v16, %v4558_v25  ;;  %1983 = vmatpush.msrb.mxu2 %v4571_v3  ;;  %2298 = vmatpush.msrb.mxu1 %v4571_v3 }
 0x101   : > { %v644_v2 = vadd.f32 %v643_v22, %v4360_v43  ;;  %v708_v10 = vadd.f32 %v707_v29, %v639_v62  ;;  %1491 = vmatmul.f32.gmra.mxu0 %v1490_v46  ;;  %v2080_v52 = vsub.f32 %v4569_v60, %v2079_v18  ;;  %v2086_v22 = vsub.f32 %v4586_v63, %v5716_v31  ;;  %v349_v29 = vld [vmem:[%s5682_s2 + $0x160] sm:$0xff] }
 0x102   : > { %2211 = vmatpush.msrb.mxu0 %v4586_v63  ;;  %v5701_v17 = vand.u32 4294901760, %v4579_v8  ;;  %v4614_v58 = vand.u32 4294901760, %v349_v29 }
 0x103   : > { %v789_v9 = vadd.f32 %v788_v30, %v708_v10  ;;  %v2081_v50 = vand.u32 4294901760, %v2080_v52  ;;  %v348_v52 = vld [vmem:[%s5682_s2 + $0x158] sm:$0xff] }
 0x104   : > { %v849_v32 = vpop.f32.mrf.mxu1  ;;  %v1513_v19 = vsub.f32 %v4579_v8, %v5701_v17 }
 0x105   : > { %v4560_v43 = vadd.f32 %v845_v27, %v789_v9  ;;  %1345 = vmatmul.f32.gmra.mxu2 %v4206_v61  ;;  %1406 = vmatmul.f32.gmra.mxu3 %v4159_v51  ;;  %v1505_v51 = vsub.f32 %v4545_v48, %v5702_v23  ;;  %v4598_v27 = vand.u32 4294901760, %v350_v33 }
 0x106   : > { %v796_v15 = vpop.f32.mrf.mxu0  ;;  %2082 = vmatpush.msrb.mxu3 %v2081_v50 }
 0x107   : > { %1632 = vmatmul.f32.gmra.mxu1 %v4506_v20  ;;  %1985 = vmatpush.msrb.mxu2 %v4598_v27  ;;  %v4612_v10 = vsub.f32 %v350_v33, %v4598_v27 }
 0x108   : > { %v648_v14 = vpop.f32.mrf.mxu2  ;;  %v713_v12 = vpop.f32.mrf.mxu3  ;;  %2300 = vmatpush.msrb.mxu1 %v4598_v27 }
 0x109   : > { %v649_v30 = vadd.f32 %v648_v14, %v4393_v1  ;;  %v714_v11 = vadd.f32 %v713_v12, %v644_v2  ;;  %1499 = vmatmul.f32.gmra.mxu0 %v1498_v36  ;;  %1987 = vmatpush.msrb.mxu2 %v4614_v58  ;;  %v4625_v14 = vsub.f32 %v349_v29, %v4614_v58 }
 0x10a   : > { %2214 = vmatpush.msrb.mxu0 %v4612_v10  ;;  %2302 = vmatpush.msrb.mxu1 %v4614_v58 }
 0x10b   : > { %v793_v62 = vadd.f32 %v792_v41, %v714_v11  ;;  %v1506_v41 = vand.u32 4294901760, %v1505_v51  ;;  %v5712_v11 = vand.u32 4294901760, %v4625_v14 }
 0x10c   : > { %v853_v1 = vpop.f32.mrf.mxu1  ;;  %2217 = vmatpush.msrb.mxu0 %v4625_v14 }
 0x10d   : > { %v4600_v46 = vadd.f32 %v849_v32, %v793_v62  ;;  %1349 = vmatmul.f32.gmra.mxu2 %v4251_v39  ;;  %1410 = vmatmul.f32.gmra.mxu3 %v4206_v61  ;;  %v2087_v61 = vand.u32 4294901760, %v2086_v22  ;;  %v5714_v32 = vand.u32 4294901760, %v4612_v10  ;;  %v4636_v62 = vand.u32 4294901760, %v348_v52 }
 0x10e   : > { %v800_v2 = vpop.f32.mrf.mxu0  ;;  %v2098_v50 = vsub.f32 %v4625_v14, %v5712_v11  ;;  %v337_v11 = vld [vmem:[%s5682_s2 + $0x100] sm:$0xff] }
 0x10f   : > { %1636 = vmatmul.f32.gmra.mxu1 %v4524_v6  ;;  %2088 = vmatpush.msrb.mxu3 %v2087_v61  ;;  %v2092_v12 = vsub.f32 %v4612_v10, %v5714_v32  ;;  %v4827_v32 = vand.u32 4294901760, %v337_v11 }
 0x110   : > { %v653_v16 = vpop.f32.mrf.mxu2  ;;  %v719_v9 = vpop.f32.mrf.mxu3  ;;  %1989 = vmatpush.msrb.mxu2 %v4636_v62  ;;  %2304 = vmatpush.msrb.mxu1 %v4636_v62 }
 0x111   : > { %v654_v36 = vadd.f32 %v653_v16, %v4426_v53  ;;  %v720_v5 = vadd.f32 %v719_v9, %v649_v30  ;;  %1507 = vmatmul.f32.gmra.mxu0 %v1506_v41  ;;  %v2093_v30 = vand.u32 4294901760, %v2092_v12  ;;  %v347_v41 = vld [vmem:[%s5682_s2 + $0x150] sm:$0xff]  ;;  %v4840_v31 = vsub.f32 %v337_v11, %v4827_v32 }
 0x112   : > { %v4653_v29 = vand.u32 4294901760, %v347_v41 }
 0x113   : > { %v797_v51 = vadd.f32 %v796_v15, %v720_v5  ;;  %v1514_v15 = vand.u32 4294901760, %v1513_v19  ;;  %2094 = vmatpush.msrb.mxu3 %v2093_v30 }
 0x114   : > { %v857_v53 = vpop.f32.mrf.mxu1  ;;  %1991 = vmatpush.msrb.mxu2 %v4653_v29  ;;  %v4661_v12 = vsub.f32 %v347_v41, %v4653_v29  ;;  %2306 = vmatpush.msrb.mxu1 %v4653_v29 }
 0x115   : > { %v4639_v33 = vadd.f32 %v853_v1, %v797_v51  ;;  %1353 = vmatmul.f32.gmra.mxu2 %v4303_v47  ;;  %1414 = vmatmul.f32.gmra.mxu3 %v4251_v39  ;;  %v4651_v1 = vsub.f32 %v348_v52, %v4636_v62  ;;  %v2099_v39 = vand.u32 4294901760, %v2098_v50  ;;  %v346_v50 = vld [vmem:[%s5682_s2 + $0x148] sm:$0xff] }
 0x116   : > { %v804_v22 = vpop.f32.mrf.mxu0  ;;  %v5706_v30 = vand.u32 4294901760, %v4661_v12 }
 0x117   : > { %1640 = vmatmul.f32.gmra.mxu1 %v4536_v28  ;;  %v5709_v9 = vand.u32 4294901760, %v4651_v1  ;;  %2220 = vmatpush.msrb.mxu0 %v4651_v1 }
 0x118   : > { %v658_v61 = vpop.f32.mrf.mxu2  ;;  %v725_v16 = vpop.f32.mrf.mxu3  ;;  %2100 = vmatpush.msrb.mxu3 %v2099_v39  ;;  %v345_v39 = vld [vmem:[%s5682_s2 + $0x140] sm:$0xff] }
 0x119   : > { %v659_v19 = vadd.f32 %v658_v61, %v4462_v38  ;;  %v726_v5 = vadd.f32 %v725_v16, %v654_v36  ;;  %1515 = vmatmul.f32.gmra.mxu0 %v1514_v15  ;;  %v2104_v51 = vsub.f32 %v4651_v1, %v5709_v9  ;;  %v4672_v15 = vand.u32 4294901760, %v346_v50 }
 0x11a   : > { %2223 = vmatpush.msrb.mxu0 %v4661_v12 }
 0x11b   : > { %v801_v52 = vadd.f32 %v800_v2, %v726_v5  ;;  %v2105_v36 = vand.u32 4294901760, %v2104_v51  ;;  %v2110_v2 = vsub.f32 %v4661_v12, %v5706_v30  ;;  %1993 = vmatpush.msrb.mxu2 %v4672_v15  ;;  %v4687_v16 = vsub.f32 %v346_v50, %v4672_v15  ;;  %2308 = vmatpush.msrb.mxu1 %v4672_v15 }
 0x11c   : > { %v861_v38 = vpop.f32.mrf.mxu1 }
 0x11d   : > { %v4675_v41 = vadd.f32 %v857_v53, %v801_v52  ;;  %1418 = vmatmul.f32.gmra.mxu3 %v4303_v47  ;;  %1698 = vmatmul.f32.vlgmr.msra.gmra.mxu2 %v4397_v44  ;;  %v4689_v53 = vand.u32 4294901760, %v345_v39  ;;  %v2111_v47 = vand.u32 4294901760, %v2110_v2  ;;  %v5705_v52 = vand.u32 4294901760, %v4687_v16 }
 0x11e   : > { %v1141_v61 = vpop.f32.mrf.mxu0  ;;  %2106 = vmatpush.msrb.mxu3 %v2105_v36  ;;  %2226 = vmatpush.msrb.mxu0 %v4687_v16 }
 0x11f   : > { %1644 = vmatmul.f32.gmra.mxu1 %v4558_v25  ;;  %1995 = vmatpush.msrb.mxu2 %v4689_v53  ;;  %v4698_v50 = vsub.f32 %v345_v39, %v4689_v53  ;;  %v2116_v2 = vsub.f32 %v4687_v16, %v5705_v52 }
 0x120   : > { %v731_v5 = vpop.f32.mrf.mxu3  ;;  %v902_v51 = vpop.f32.mrf.mxu2  ;;  %2112 = vmatpush.msrb.mxu3 %v2111_v47  ;;  %2310 = vmatpush.msrb.mxu1 %v4689_v53 }
 0x121   : > { %v732_v17 = vadd.f32 %v731_v5, %v659_v19  ;;  %v903_v36 = vadd.f32 %v902_v51, %v4501_v4  ;;  %1883 = vmatmul.f32.vlgmr.msra.gmra.mxu0 %v4381_v7  ;;  %v5704_v56 = vand.u32 4294901760, %v4698_v50  ;;  %v344_v19 = vld [vmem:[%s5682_s2 + $0x138] sm:$0xff]  ;;  %v2117_v47 = vand.u32 4294901760, %v2116_v2 }
 0x122   : > { %2229 = vmatpush.msrb.mxu0 %v4698_v50  ;;  %v4709_v5 = vand.u32 4294901760, %v344_v19 }
 0x123   : > { %v805_v23 = vadd.f32 %v804_v22, %v732_v17  ;;  %v2122_v17 = vsub.f32 %v4698_v50, %v5704_v56  ;;  %v343_v22 = vld [vmem:[%s5682_s2 + $0x130] sm:$0xff]  ;;  %2118 = vmatpush.msrb.mxu3 %v2117_v47 }
 0x124   : > { %v1215_v4 = vpop.f32.mrf.mxu1  ;;  %1997 = vmatpush.msrb.mxu2 %v4709_v5  ;;  %2312 = vmatpush.msrb.mxu1 %v4709_v5 }
 0x125   : > { %v4712_v39 = vadd.f32 %v861_v38, %v805_v23  ;;  %1703 = vmatmul.f32.gmra.mxu2 %v4433_v59  ;;  %1772 = vmatmul.f32.vlgmr.msra.gmra.mxu3 %v1456_v24  ;;  %v4725_v23 = vsub.f32 %v344_v19, %v4709_v5  ;;  %v4727_v38 = vand.u32 4294901760, %v343_v22  ;;  %v2123_v44 = vand.u32 4294901760, %v2122_v17 }
 0x126   : > { %v1146_v51 = vpop.f32.mrf.mxu0 }
 0x127   : > { %1948 = vmatmul.f32.vlgmr.msra.gmra.mxu1 %v4381_v7  ;;  %v5708_v56 = vand.u32 4294901760, %v4725_v23  ;;  %1999 = vmatpush.msrb.mxu2 %v4727_v38  ;;  %v4736_v19 = vsub.f32 %v343_v22, %v4727_v38 }
 0x128   : > { %v910_v24 = vpop.f32.mrf.mxu2  ;;  %v1059_v2 = vpop.f32.mrf.mxu3  ;;  %2232 = vmatpush.msrb.mxu0 %v4725_v23  ;;  %2124 = vmatpush.msrb.mxu3 %v2123_v44 }
 0x129   : > { %v911_v47 = vadd.f32 %v910_v24, %v4519_v26  ;;  %v1060_v52 = vadd.f32 %v1059_v2, %v903_v36  ;;  %1887 = vmatmul.f32.gmra.mxu0 %v4413_v42  ;;  %v2128_v7 = vsub.f32 %v4725_v23, %v5708_v56  ;;  %v5707_v30 = vand.u32 4294901760, %v4736_v19  ;;  %v342_v26 = vld [vmem:[%s5682_s2 + $0x128] sm:$0xff]  ;;  %2314 = vmatpush.msrb.mxu1 %v4727_v38 }
 0x12a   : > { %2235 = vmatpush.msrb.mxu0 %v4736_v19  ;;  %v4747_v24 = vand.u32 4294901760, %v342_v26 }
 0x12b   : > { %v1142_v17 = vadd.f32 %v1141_v61, %v1060_v52  ;;  %v2129_v44 = vand.u32 4294901760, %v2128_v7  ;;  %v2134_v61 = vsub.f32 %v4736_v19, %v5707_v30  ;;  %v341_v52 = vld [vmem:[%s5682_s2 + $0x120] sm:$0xff] }
 0x12c   : > { %v1221_v36 = vpop.f32.mrf.mxu1  ;;  %2001 = vmatpush.msrb.mxu2 %v4747_v24  ;;  %v4765_v7 = vand.u32 4294901760, %v341_v52  ;;  %2316 = vmatpush.msrb.mxu1 %v4747_v24 }
 0x12d   : > { %v4750_v22 = vadd.f32 %v1215_v4, %v1142_v17  ;;  %1708 = vmatmul.f32.gmra.mxu2 %v4468_v45  ;;  %1778 = vmatmul.f32.gmra.mxu3 %v1464_v35  ;;  %v4763_v4 = vsub.f32 %v342_v26, %v4747_v24  ;;  %v2135_v59 = vand.u32 4294901760, %v2134_v61 }
 0x12e   : > { %v1151_v2 = vpop.f32.mrf.mxu0  ;;  %2130 = vmatpush.msrb.mxu3 %v2129_v44  ;;  %2003 = vmatpush.msrb.mxu2 %v4765_v7  ;;  %v4774_v26 = vsub.f32 %v341_v52, %v4765_v7 }
 0x12f   : > { %1952 = vmatmul.f32.gmra.mxu1 %v4413_v42  ;;  %v5711_v30 = vand.u32 4294901760, %v4763_v4  ;;  %2238 = vmatpush.msrb.mxu0 %v4763_v4 }
 0x130   : > { %v918_v35 = vpop.f32.mrf.mxu2  ;;  %v1063_v17 = vpop.f32.mrf.mxu3  ;;  %2136 = vmatpush.msrb.mxu3 %v2135_v59  ;;  %v5710_v9 = vand.u32 4294901760, %v4774_v26  ;;  %2318 = vmatpush.msrb.mxu1 %v4765_v7 }
 0x131   : > { %v919_v44 = vadd.f32 %v918_v35, %v4538_v13  ;;  %v1064_v56 = vadd.f32 %v1063_v17, %v911_v47  ;;  %1891 = vmatmul.f32.gmra.mxu0 %v4450_v55  ;;  %v2140_v42 = vsub.f32 %v4763_v4, %v5711_v30  ;;  %v340_v13 = vld [vmem:[%s5682_s2 + $0x118] sm:$0xff] }
 0x132   : > { %2241 = vmatpush.msrb.mxu0 %v4774_v26  ;;  %v4785_v35 = vand.u32 4294901760, %v340_v13 }
 0x133   : > { %v1147_v61 = vadd.f32 %v1146_v51, %v1064_v56  ;;  %v2141_v59 = vand.u32 4294901760, %v2140_v42  ;;  %v2146_v56 = vsub.f32 %v4774_v26, %v5710_v9  ;;  %v339_v51 = vld [vmem:[%s5682_s2 + $0x110] sm:$0xff] }
 0x134   : > { %v1227_v47 = vpop.f32.mrf.mxu1  ;;  %2005 = vmatpush.msrb.mxu2 %v4785_v35  ;;  %v4803_v42 = vand.u32 4294901760, %v339_v51  ;;  %2320 = vmatpush.msrb.mxu1 %v4785_v35 }
 0x135   : > { %v4788_v52 = vadd.f32 %v1221_v36, %v1147_v61  ;;  %1713 = vmatmul.f32.gmra.mxu2 %v4496_v34  ;;  %1784 = vmatmul.f32.gmra.mxu3 %v1472_v40  ;;  %v4801_v36 = vsub.f32 %v340_v13, %v4785_v35  ;;  %v2147_v45 = vand.u32 4294901760, %v2146_v56  ;;  %v338_v40 = vld [vmem:[%s5682_s2 + $0x108] sm:$0xff] }
 0x136   : > { %v1156_v17 = vpop.f32.mrf.mxu0  ;;  %2142 = vmatpush.msrb.mxu3 %v2141_v59  ;;  %2007 = vmatpush.msrb.mxu2 %v4803_v42  ;;  %v4812_v59 = vsub.f32 %v339_v51, %v4803_v42  ;;  %v4814_v13 = vand.u32 4294901760, %v338_v40 }
 0x137   : > { %1956 = vmatmul.f32.gmra.mxu1 %v4450_v55  ;;  %v5715_v30 = vand.u32 4294901760, %v4801_v36  ;;  %2244 = vmatpush.msrb.mxu0 %v4801_v36 }
 0x138   : > { %v926_v61 = vpop.f32.mrf.mxu2  ;;  %v1067_v9 = vpop.f32.mrf.mxu3  ;;  %2148 = vmatpush.msrb.mxu3 %v2147_v45  ;;  %v5717_v51 = vand.u32 4294901760, %v4812_v59  ;;  %2009 = vmatpush.msrb.mxu2 %v4814_v13 }
 0x139   : > { %v927_v55 = vadd.f32 %v926_v61, %v4560_v43  ;;  %v1068_v56 = vadd.f32 %v1067_v9, %v919_v44  ;;  %1895 = vmatmul.f32.gmra.mxu0 %v4481_v54  ;;  %v2152_v0 = vsub.f32 %v4801_v36, %v5715_v30  ;;  %v4830_v43 = vsub.f32 %v338_v40, %v4814_v13 }
 0x13a   : > { %2247 = vmatpush.msrb.mxu0 %v4812_v59  ;;  %v2158_v61 = vsub.f32 %v4812_v59, %v5717_v51  ;;  %2011 = vmatpush.msrb.mxu2 %v4827_v32  ;;  %v2169_v51 = vand.u32 4294901760, %v4840_v31 }
 0x13b   : > { %v1152_v9 = vadd.f32 %v1151_v2, %v1068_v56  ;;  %v2153_v45 = vand.u32 4294901760, %v2152_v0  ;;  %v2163_v30 = vand.u32 4294901760, %v4830_v43  ;;  %2322 = vmatpush.msrb.mxu1 %v4803_v42 }
 0x13c   : > { %v1233_v44 = vpop.f32.mrf.mxu1  ;;  %v2159_v2 = vand.u32 4294901760, %v2158_v61  ;;  %2379 = vmatpush.msra.mxu2 %v2079_v18  ;;  %2250 = vmatpush.msrb.mxu0 %v4830_v43  ;;  %v5758_v61 = vand.u32 4294901760, %v4612_v10 }
 0x13d   : > { %v4843_v40 = vadd.f32 %v1227_v47, %v1152_v9  ;;  %1718 = vmatmul.f32.gmra.mxu2 %v4516_v49  ;;  %1790 = vmatmul.f32.gmra.mxu3 %v1480_v57  ;;  %v2164_v56 = vsub.f32 %v4830_v43, %v2163_v30  ;;  %v2170_v57 = vsub.f32 %v4840_v31, %v2169_v51 }
 0x13e   : > { %v1161_v0 = vpop.f32.mrf.mxu0  ;;  %2154 = vmatpush.msrb.mxu3 %v2153_v45  ;;  %2324 = vmatpush.msrb.mxu1 %v4814_v13 }
 0x13f   : > { %1960 = vmatmul.f32.gmra.mxu1 %v4481_v54  ;;  %v2165_v34 = vand.u32 4294901760, %v2164_v56  ;;  %v5757_v54 = vand.u32 4294901760, %v4586_v63  ;;  %v2171_v60 = vand.u32 4294901760, %v2170_v57  ;;  %2253 = vmatpush.msrb.mxu0 %v4840_v31  ;;  %v275_v56 = vld [vmem:[%s3439_s9 + $0x10] sm:$0xff] }
 0x140   : > { %v934_v11 = vpop.f32.mrf.mxu2  ;;  %v1071_v47 = vpop.f32.mrf.mxu3  ;;  %2160 = vmatpush.msrb.mxu3 %v2159_v2  ;;  %2326 = vmatpush.msrb.mxu1 %v4827_v32 }
 0x141   : > { %v935_v9 = vadd.f32 %v934_v11, %v4600_v46  ;;  %v1072_v45 = vadd.f32 %v1071_v47, %v927_v55  ;;  %1899 = vmatmul.f32.gmra.mxu0 %v4506_v20  ;;  %2383 = vmatpush.msra.mxu2 %v5757_v54  ;;  %v5759_v55 = vand.u32 4294901760, %v4516_v49 }
 0x142   : > { %2166 = vmatpush.msrb.mxu3 %v2165_v34  ;;  %v4883_v34 = vand.u32 4294901760, %v275_v56 }
 0x143   : > { %v1157_v18 = vadd.f32 %v1156_v17, %v1072_v45  ;;  %2387 = vmatpush.msra.mxu2 %v5758_v61  ;;  %v5760_v17 = vand.u32 4294901760, %v4625_v14 }
 0x144   : > { %v1239_v2 = vpop.f32.mrf.mxu1  ;;  %2172 = vmatpush.msrb.mxu3 %v2171_v60  ;;  %v4897_v57 = vsub.f32 %v275_v56, %v4883_v34 }
 0x145   : > { %v4868_v46 = vadd.f32 %v1233_v44, %v1157_v18  ;;  %1723 = vmatmul.f32.gmra.mxu2 %v4533_v37  ;;  %1796 = vmatmul.f32.gmra.mxu3 %v5759_v55  ;;  %v5761_v44 = vand.u32 4294901760, %v4651_v1  ;;  %v5766_v18 = vand.u32 4294901760, %v4725_v23 }
 0x146   : > { %v1166_v63 = vpop.f32.mrf.mxu0  ;;  %2474 = vmatpush.msra.mxu3 %v4556_v21  ;;  %2391 = vmatpush.msra.mxu2 %v5760_v17  ;;  %v5762_v21 = vand.u32 4294901760, %v4661_v12 }
 0x147   : > { %1964 = vmatmul.f32.gmra.mxu1 %v4506_v20 }
 0x148   : > { %v942_v10 = vpop.f32.mrf.mxu2  ;;  %v1075_v11 = vpop.f32.mrf.mxu3  ;;  %2476 = vmatpush.msra.mxu3 %v4571_v3  ;;  %2395 = vmatpush.msra.mxu2 %v5761_v44  ;;  %v5763_v3 = vand.u32 4294901760, %v4687_v16  ;;  %v5765_v16 = vand.u32 4294901760, %v4698_v50 }
 0x149   : > { %v943_v47 = vadd.f32 %v942_v10, %v4639_v33  ;;  %v1076_v49 = vadd.f32 %v1075_v11, %v935_v9  ;;  %1903 = vmatmul.f32.gmra.mxu0 %v4524_v6  ;;  %v5764_v33 = vand.u32 4294901760, %v4533_v37  ;;  %v283_v10 = vld [vmem:[%s3439_s9 + $0x50] sm:$0xff]  ;;  %v366_v11 = vld [vmem:[%s5682_s2 + $0x1e8] sm:$0xff] }
 0x14a   : > { %2478 = vmatpush.msra.mxu3 %v4598_v27  ;;  %2399 = vmatpush.msra.mxu2 %v5762_v21  ;;  %v368_v27 = vld [vmem:[%s5682_s2 + $0x1f8] sm:$0xff] }
 0x14b   : > { %v1162_v20 = vadd.f32 %v1161_v0, %v1076_v49  ;;  %v279_v0 = vld [vmem:[%s3439_s9 + $0x30] sm:$0xff]  ;;  %v4956_v49 = vand.u32 4294901760, %v366_v11 }
 0x14c   : > { %v1245_v14 = vpop.f32.mrf.mxu1  ;;  %2480 = vmatpush.msra.mxu3 %v4614_v58  ;;  %2403 = vmatpush.msra.mxu2 %v5763_v3  ;;  %v4903_v58 = vand.u32 4294901760, %v368_v27  ;;  %v4917_v50 = vand.u32 4294901760, %v279_v0 }
 0x14d   : > { %v4891_v1 = vadd.f32 %v1239_v2, %v1162_v20  ;;  %1728 = vmatmul.f32.gmra.mxu2 %v4545_v48  ;;  %1802 = vmatmul.f32.gmra.mxu3 %v5764_v33  ;;  %v5767_v2 = vand.u32 4294901760, %v4736_v19  ;;  %v4969_v33 = vsub.f32 %v366_v11, %v4956_v49 }
 0x14e   : > { %v1171_v12 = vpop.f32.mrf.mxu0  ;;  %2482 = vmatpush.msra.mxu3 %v4636_v62  ;;  %2407 = vmatpush.msra.mxu2 %v5765_v16  ;;  %v4911_v45 = vsub.f32 %v368_v27, %v4903_v58  ;;  %v2014_v62 = vand.u32 4294901760, %v4897_v57 }
 0x14f   : > { %1968 = vmatmul.f32.gmra.mxu1 %v4524_v6  ;;  %2539 = vmatpush.msra.mxu0 %v4903_v58  ;;  %v367_v6 = vld [vmem:[%s5682_s2 + $0x1f0] sm:$0xff] }
 0x150   : > { %v950_v37 = vpop.f32.mrf.mxu2  ;;  %v1079_v9 = vpop.f32.mrf.mxu3  ;;  %2484 = vmatpush.msra.mxu3 %v4653_v29  ;;  %2411 = vmatpush.msra.mxu2 %v5766_v18  ;;  %v5730_v61 = vand.u32 4294901760, %v4911_v45  ;;  %v4925_v29 = vand.u32 4294901760, %v367_v6  ;;  %v2015_v19 = vsub.f32 %v4897_v57, %v2014_v62 }
 0x151   : > { %v951_v54 = vadd.f32 %v950_v37, %v4675_v41  ;;  %v1080_v60 = vadd.f32 %v1079_v9, %v943_v47  ;;  %1907 = vmatmul.f32.gmra.mxu0 %v4536_v28  ;;  %v5727_v37 = vand.u32 4294901760, %v4969_v33 }
 0x152   : > { %2486 = vmatpush.msra.mxu3 %v4672_v15  ;;  %2415 = vmatpush.msra.mxu2 %v5767_v2  ;;  %v2638_v56 = vsub.f32 %v4911_v45, %v5730_v61  ;;  %v4935_v23 = vsub.f32 %v367_v6, %v4925_v29  ;;  %v5768_v15 = vand.u32 4294901760, %v4545_v48  ;;  %v5769_v48 = vand.u32 4294901760, %v4763_v4 }
 0x153   : > { %v1167_v41 = vadd.f32 %v1166_v63, %v1080_v60  ;;  %2541 = vmatpush.msra.mxu0 %v4925_v29  ;;  %v4947_v63 = vsub.f32 %v279_v0, %v4917_v50  ;;  %v2016_v27 = vand.u32 4294901760, %v2015_v19  ;;  %v365_v0 = vld [vmem:[%s5682_s2 + $0x1e0] sm:$0xff]  ;;  %v5770_v60 = vand.u32 4294901760, %v4774_v26 }
 0x154   : > { %v1251_v55 = vpop.f32.mrf.mxu1  ;;  %2488 = vmatpush.msra.mxu3 %v4689_v53  ;;  %v2639_v44 = vand.u32 4294901760, %v2638_v56  ;;  %v5729_v47 = vand.u32 4294901760, %v4935_v23  ;;  %2419 = vmatpush.msra.mxu2 %v5769_v48  ;;  %v4979_v9 = vand.u32 4294901760, %v365_v0  ;;  %v287_v56 = vld [vmem:[%s3439_s9 + $0x70] sm:$0xff] }
 0x155   : > { %v4938_v17 = vadd.f32 %v1245_v14, %v1167_v41  ;;  %1733 = vmatmul.f32.gmra.mxu2 %v4579_v8  ;;  %1808 = vmatmul.f32.gmra.mxu3 %v5768_v15  ;;  %v4962_v14 = vand.u32 4294901760, %v283_v10  ;;  %v364_v41 = vld [vmem:[%s5682_s2 + $0x1d8] sm:$0xff] }
 0x156   : > { %v4953_v53 = vpop.f32.mrf.mxu0  ;;  %2490 = vmatpush.msra.mxu3 %v4709_v5  ;;  %2640 = vmatpush.msra.mxu1 %v2639_v44  ;;  %v2644_v3 = vsub.f32 %v4935_v23, %v5729_v47  ;;  %v4992_v18 = vsub.f32 %v365_v0, %v4979_v9 }
 0x157   : > { %1972 = vmatmul.f32.gmra.mxu1 %v4536_v28  ;;  %2543 = vmatpush.msra.mxu0 %v4956_v49  ;;  %v2022_v28 = vand.u32 4294901760, %v4947_v63  ;;  %v4985_v6 = vsub.f32 %v283_v10, %v4962_v14 }
 0x158   : > { %v958_v21 = vpop.f32.mrf.mxu2  ;;  %v1083_v20 = vpop.f32.mrf.mxu3  ;;  %2492 = vmatpush.msra.mxu3 %v4727_v38  ;;  %v2645_v16 = vand.u32 4294901760, %v2644_v3  ;;  %2423 = vmatpush.msra.mxu2 %v5770_v60  ;;  %v2650_v38 = vsub.f32 %v4969_v33, %v5727_v37  ;;  %v5726_v19 = vand.u32 4294901760, %v4992_v18  ;;  %v363_v3 = vld [vmem:[%s5682_s2 + $0x1d0] sm:$0xff] }
 0x159   : > { %v959_v5 = vadd.f32 %v958_v21, %v4712_v39  ;;  %v1084_v4 = vadd.f32 %v1083_v20, %v951_v54  ;;  %1911 = vmatmul.f32.gmra.mxu0 %v4558_v25  ;;  %v2030_v44 = vand.u32 4294901760, %v4985_v6  ;;  %v5031_v0 = vand.u32 4294901760, %v363_v3 }
 0x15a   : > { %2494 = vmatpush.msra.mxu3 %v4747_v24  ;;  %2646 = vmatpush.msra.mxu1 %v2645_v16  ;;  %v2023_v24 = vsub.f32 %v4947_v63, %v2022_v28  ;;  %v2651_v15 = vand.u32 4294901760, %v2650_v38  ;;  %v2656_v48 = vsub.f32 %v4992_v18, %v5726_v19 }
 0x15b   : > { %v1172_v39 = vadd.f32 %v1171_v12, %v1084_v4  ;;  %2545 = vmatpush.msra.mxu0 %v4979_v9  ;;  %v5771_v12 = vand.u32 4294901760, %v4579_v8  ;;  %v5772_v8 = vand.u32 4294901760, %v4801_v36  ;;  %v2031_v60 = vsub.f32 %v4985_v6, %v2030_v44 }
 0x15c   : > { %v1257_v54 = vpop.f32.mrf.mxu1  ;;  %2496 = vmatpush.msra.mxu3 %v4765_v7  ;;  %2652 = vmatpush.msra.mxu1 %v2651_v15  ;;  %v2024_v20 = vand.u32 4294901760, %v2023_v24  ;;  %v2657_v4 = vand.u32 4294901760, %v2656_v48 }
 0x15d   : > { %v4994_v26 = vadd.f32 %v1251_v55, %v1172_v39  ;;  %1814 = vmatmul.f32.gmra.mxu3 %v5771_v12  ;;  %2017 = vmatmul.f32.vlgmr.msrb.gmra.mxu2 %v2016_v27  ;;  %v5008_v55 = vand.u32 4294901760, %v364_v41  ;;  %v291_v12 = vld [vmem:[%s3439_s9 + $0x90] sm:$0xff] }
 0x15e   : > { %v5004_v2 = vpop.f32.mrf.mxu0  ;;  %2427 = vmatpush.msra.mxu2 %v5772_v8  ;;  %2498 = vmatpush.msra.mxu3 %v4785_v35  ;;  %v2032_v8 = vand.u32 4294901760, %v2031_v60 }
 0x15f   : > { %1976 = vmatmul.f32.gmra.mxu1 %v4558_v25  ;;  %2547 = vmatpush.msra.mxu0 %v5008_v55  ;;  %v5020_v21 = vsub.f32 %v364_v41, %v5008_v55  ;;  %v5024_v25 = vand.u32 4294901760, %v287_v56 }
 0x160   : > { %v1087_v10 = vpop.f32.mrf.mxu3  ;;  %v1326_v11 = vpop.f32.mrf.mxu2  ;;  %2500 = vmatpush.msra.mxu3 %v4803_v42  ;;  %2658 = vmatpush.msra.mxu1 %v2657_v4  ;;  %v295_v4 = vld [vmem:[%s3439_s9 + $0xb0] sm:$0xff] }
 0x161   : > { %v1088_v7 = vadd.f32 %v1087_v10, %v959_v5  ;;  %v1327_v36 = vadd.f32 %v1326_v11, %v4750_v22  ;;  %2256 = vmatmul.f32.vlgmr.msrb.gmra.mxu0 %v4897_v57  ;;  %5773 = vst [vmem:[#allocation6_spill] sm:$0xff] %v5024_v25  ;;  %v5724_v27 = vand.u32 4294901760, %v5020_v21  ;;  %v5774_v5 = vand.u32 4294901760, %v4812_v59 }
 0x162   : > { %2549 = vmatpush.msra.mxu0 %v5031_v0  ;;  %v5045_v59 = vsub.f32 %v363_v3, %v5031_v0  ;;  %v5051_v42 = vsub.f32 %v287_v56, %v5024_v25  ;;  %2502 = vmatpush.msra.mxu3 %v4814_v13  ;;  %v5077_v57 = vand.u32 4294901760, %v291_v12 }
 0x163   : > { %2431 = vmatpush.msra.mxu2 %v5774_v5  ;;  %v1177_v22 = vadd.f32 %v4953_v53, %v1088_v7  ;;  %v2662_v35 = vsub.f32 %v5020_v21, %v5724_v27  ;;  %v362_v53 = vld [vmem:[%s5682_s2 + $0x1c8] sm:$0xff]  ;;  %v360_v5 = vld [vmem:[%s5682_s2 + $0x1b8] sm:$0xff] }
 0x164   : > { %v1617_v16 = vpop.f32.mrf.mxu1  ;;  %v5722_v41 = vand.u32 4294901760, %v5045_v59  ;;  %v5060_v15 = vand.u32 4294901760, %v362_v53  ;;  %v2038_v13 = vand.u32 4294901760, %v5051_v42  ;;  %5775 = vst [vmem:[#allocation7_spill] sm:$0xff] %v5077_v57  ;;  %2504 = vmatpush.msra.mxu3 %v4827_v32 }
 0x165   : > { %v5047_v39 = vadd.f32 %v1257_v54, %v1177_v22  ;;  %2025 = vmatmul.f32.gmra.mxu2 %v2024_v20  ;;  %2174 = vmatmul.f32.vlgmr.msrb.gmra.mxu3 %v4883_v34  ;;  %v2663_v24 = vand.u32 4294901760, %v2662_v35  ;;  %v5114_v35 = vand.u32 4294901760, %v360_v5 }
 0x166   : > { %v5056_v38 = vpop.f32.mrf.mxu0  ;;  %2435 = vmatpush.msra.mxu2 %v2163_v30  ;;  %v2668_v10 = vsub.f32 %v5045_v59, %v5722_v41  ;;  %2551 = vmatpush.msra.mxu0 %v5060_v15  ;;  %v5072_v11 = vsub.f32 %v362_v53, %v5060_v15  ;;  %v2039_v32 = vsub.f32 %v5051_v42, %v2038_v13 }
 0x167   : > { %2330 = vmatmul.f32.vlgmr.msrb.gmra.mxu1 %v2014_v62  ;;  %v361_v62 = vld [vmem:[%s5682_s2 + $0x1c0] sm:$0xff]  ;;  %2854 = vmatpush.msrb.mxu3 %v4903_v58 }
 0x168   : > { %v1330_v54 = vpop.f32.mrf.mxu2  ;;  %v1391_v56 = vpop.f32.mrf.mxu3  ;;  %2664 = vmatpush.msra.mxu1 %v2663_v24  ;;  %2439 = vmatpush.msra.mxu2 %v2169_v51  ;;  %v2669_v48 = vand.u32 4294901760, %v2668_v10  ;;  %v5720_v7 = vand.u32 4294901760, %v5072_v11  ;;  %v5085_v20 = vand.u32 4294901760, %v361_v62  ;;  %v5120_v24 = vand.u32 4294901760, %v295_v4 }
 0x169   : > { %v1331_v30 = vadd.f32 %v1330_v54, %v4788_v52  ;;  %v1392_v43 = vadd.f32 %v1391_v56, %v1327_v36  ;;  %2261 = vmatmul.f32.gmra.mxu0 %v4947_v63  ;;  %2856 = vmatpush.msrb.mxu3 %v4925_v29  ;;  %v5127_v56 = vsub.f32 %v360_v5, %v5114_v35 }
 0x16a   : > { %2766 = vmatpush.msrb.mxu2 %v4911_v45  ;;  %2670 = vmatpush.msra.mxu1 %v2669_v48  ;;  %v2674_v31 = vsub.f32 %v5072_v11, %v5720_v7  ;;  %v5096_v51 = vsub.f32 %v361_v62, %v5085_v20 }
 0x16b   : > { %v1461_v52 = vadd.f32 %v5004_v2, %v1392_v43  ;;  %2553 = vmatpush.msra.mxu0 %v5085_v20  ;;  %v5105_v2 = vsub.f32 %v291_v12, %v5077_v57  ;;  %v2040_v43 = vand.u32 4294901760, %v2039_v32  ;;  %v5718_v48 = vand.u32 4294901760, %v5127_v56  ;;  %2858 = vmatpush.msrb.mxu3 %v4956_v49 }
 0x16c   : > { %v1621_v36 = vpop.f32.mrf.mxu1  ;;  %v2675_v60 = vand.u32 4294901760, %v2674_v31  ;;  %2769 = vmatpush.msrb.mxu2 %v4935_v23  ;;  %v5143_v31 = vsub.f32 %v295_v4, %v5120_v24  ;;  %v358_v4 = vld [vmem:[%s5682_s2 + $0x1a8] sm:$0xff] }
 0x16d   : > { %v5098_v3 = vadd.f32 %v1617_v16, %v1461_v52  ;;  %2033 = vmatmul.f32.gmra.mxu2 %v2032_v8  ;;  %2178 = vmatmul.f32.gmra.mxu3 %v4917_v50  ;;  %v5719_v16 = vand.u32 4294901760, %v5096_v51  ;;  %v5732_v63 = vand.u32 4294901760, %v5105_v2  ;;  %v2686_v32 = vsub.f32 %v5127_v56, %v5718_v48 }
 0x16e   : > { %v5111_v22 = vpop.f32.mrf.mxu0  ;;  %2676 = vmatpush.msra.mxu1 %v2675_v60  ;;  %2555 = vmatpush.msra.mxu0 %v5114_v35 }
 0x16f   : > { %2336 = vmatmul.f32.gmra.mxu1 %v2022_v28  ;;  %v2680_v54 = vsub.f32 %v5096_v51, %v5719_v16  ;;  %v359_v28 = vld [vmem:[%s5682_s2 + $0x1b0] sm:$0xff]  ;;  %2772 = vmatpush.msrb.mxu2 %v4969_v33 }
 0x170   : > { %v1334_v53 = vpop.f32.mrf.mxu2  ;;  %v1395_v12 = vpop.f32.mrf.mxu3  ;;  %v5137_v52 = vand.u32 4294901760, %v359_v28  ;;  %2860 = vmatpush.msrb.mxu3 %v4979_v9 }
 0x171   : > { %v1335_v8 = vadd.f32 %v1334_v53, %v4843_v40  ;;  %v1396_v10 = vadd.f32 %v1395_v12, %v1331_v30  ;;  %2266 = vmatmul.f32.gmra.mxu0 %v4985_v6  ;;  %v2681_v62 = vand.u32 4294901760, %v2680_v54  ;;  %2775 = vmatpush.msrb.mxu2 %v4992_v18  ;;  %v299_v12 = vld [vmem:[%s3439_s9 + $0xd0] sm:$0xff]  ;;  %v2687_v54 = vand.u32 4294901760, %v2686_v32 }
 0x172   : > { %2557 = vmatpush.msra.mxu0 %v5137_v52  ;;  %v5150_v5 = vsub.f32 %v359_v28, %v5137_v52  ;;  %v5165_v28 = vand.u32 4294901760, %v358_v4  ;;  %v5181_v6 = vand.u32 4294901760, %v299_v12  ;;  %2862 = vmatpush.msrb.mxu3 %v5008_v55 }
 0x173   : > { %v1469_v40 = vadd.f32 %v5056_v38, %v1396_v10  ;;  %2682 = vmatpush.msra.mxu1 %v2681_v62  ;;  %v2047_v38 = vsub.f32 %v5105_v2, %v5732_v63  ;;  %2778 = vmatpush.msrb.mxu2 %v5020_v21  ;;  %v5725_v62 = vand.u32 4294901760, %v5143_v31 }
 0x174   : > { %v1625_v30 = vpop.f32.mrf.mxu1  ;;  %v5721_v10 = vand.u32 4294901760, %v5150_v5  ;;  %2559 = vmatpush.msra.mxu0 %v5165_v28  ;;  %v5177_v32 = vsub.f32 %v358_v4, %v5165_v28  ;;  %2864 = vmatpush.msrb.mxu3 %v5031_v0 }
 0x175   : > { %v5152_v60 = vadd.f32 %v1621_v36, %v1469_v40  ;;  %2041 = vmatmul.f32.gmra.mxu2 %v2040_v43  ;;  %2182 = vmatmul.f32.gmra.mxu3 %v4962_v14  ;;  %v2048_v7 = vand.u32 4294901760, %v2047_v38  ;;  %v2055_v38 = vsub.f32 %v5143_v31, %v5725_v62 }
 0x176   : > { %v5161_v53 = vpop.f32.mrf.mxu0  ;;  %2688 = vmatpush.msra.mxu1 %v2687_v54  ;;  %v2692_v40 = vsub.f32 %v5150_v5, %v5721_v10  ;;  %v5723_v10 = vand.u32 4294901760, %v5177_v32  ;;  %2781 = vmatpush.msrb.mxu2 %v5045_v59 }
 0x177   : > { %2342 = vmatmul.f32.gmra.mxu1 %v2030_v44  ;;  %v357_v44 = vld [vmem:[%s5682_s2 + $0x1a0] sm:$0xff]  ;;  %2866 = vmatpush.msrb.mxu3 %v5060_v15 }
 0x178   : > { %v1338_v36 = vpop.f32.mrf.mxu2  ;;  %v1399_v43 = vpop.f32.mrf.mxu3  ;;  %v2693_v54 = vand.u32 4294901760, %v2692_v40  ;;  %v5188_v41 = vand.u32 4294901760, %v357_v44  ;;  %v2698_v4 = vsub.f32 %v5177_v32, %v5723_v10  ;;  %2784 = vmatpush.msrb.mxu2 %v5072_v11 }
 0x179   : > { %v1339_v48 = vadd.f32 %v1338_v36, %v4868_v46  ;;  %v1400_v16 = vadd.f32 %v1399_v43, %v1335_v8  ;;  %2271 = vmatmul.f32.gmra.mxu0 %v5051_v42  ;;  %2868 = vmatpush.msrb.mxu3 %v5085_v20 }
 0x17a   : > { %2694 = vmatpush.msra.mxu1 %v2693_v54  ;;  %2561 = vmatpush.msra.mxu0 %v5188_v41  ;;  %v5201_v36 = vsub.f32 %v357_v44, %v5188_v41  ;;  %v303_v54 = vld [vmem:[%s3439_s9 + $0xf0] sm:$0xff]  ;;  %v2699_v10 = vand.u32 4294901760, %v2698_v4 }
 0x17b   : > { %v1477_v46 = vadd.f32 %v5111_v22, %v1400_v16  ;;  %v5207_v22 = vsub.f32 %v299_v12, %v5181_v6  ;;  %v356_v16 = vld [vmem:[%s5682_s2 + $0x198] sm:$0xff]  ;;  %2787 = vmatpush.msrb.mxu2 %v5096_v51  ;;  %2870 = vmatpush.msrb.mxu3 %v5114_v35 }
 0x17c   : > { %v1629_v8 = vpop.f32.mrf.mxu1  ;;  %v5728_v27 = vand.u32 4294901760, %v5201_v36  ;;  %v5216_v44 = vand.u32 4294901760, %v356_v16  ;;  %2700 = vmatpush.msra.mxu1 %v2699_v10  ;;  %v354_v10 = vld [vmem:[%s5682_s2 + $0x188] sm:$0xff] }
 0x17d   : > { %v5203_v43 = vadd.f32 %v1625_v30, %v1477_v46  ;;  %2049 = vmatmul.f32.gmra.mxu2 %v2048_v7  ;;  %2186 = vmatmul.f32.gmra.mxu3 %v5024_v25  ;;  %v355_v7 = vld [vmem:[%s5682_s2 + $0x190] sm:$0xff]  ;;  %v2056_v46 = vand.u32 4294901760, %v2055_v38  ;;  %v5735_v37 = vand.u32 4294901760, %v5207_v22  ;;  %v5237_v38 = vand.u32 4294901760, %v303_v54 }
 0x17e   : > { %v5212_v40 = vpop.f32.mrf.mxu0  ;;  %v2704_v4 = vsub.f32 %v5201_v36, %v5728_v27  ;;  %2563 = vmatpush.msra.mxu0 %v5216_v44  ;;  %v5230_v62 = vsub.f32 %v356_v16, %v5216_v44  ;;  %v5232_v19 = vand.u32 4294901760, %v355_v7  ;;  %2790 = vmatpush.msrb.mxu2 %v5127_v56 }
 0x17f   : > { %5776 = vst [vmem:[#allocation8_spill] sm:$0xff] %v5203_v43  ;;  %2348 = vmatmul.f32.gmra.mxu1 %v2038_v13  ;;  %2872 = vmatpush.msrb.mxu3 %v5137_v52 }
 0x180   : > { %v1342_v30 = vpop.f32.mrf.mxu2  ;;  %v1403_v12 = vpop.f32.mrf.mxu3  ;;  %v2705_v27 = vand.u32 4294901760, %v2704_v4  ;;  %v5731_v16 = vand.u32 4294901760, %v5230_v62  ;;  %2565 = vmatpush.msra.mxu0 %v5232_v19  ;;  %2793 = vmatpush.msrb.mxu2 %v5150_v5 }
 0x181   : > { %v1343_v42 = vadd.f32 %v1342_v30, %v4891_v1  ;;  %v1404_v13 = vadd.f32 %v1403_v12, %v1339_v48  ;;  %2276 = vmatmul.f32.gmra.mxu0 %v5105_v2  ;;  %v5246_v1 = vsub.f32 %v355_v7, %v5232_v19  ;;  %v5248_v48 = vand.u32 4294901760, %v354_v10  ;;  %v353_v12 = vld [vmem:[%s5682_s2 + $0x180] sm:$0xff]  ;;  %2874 = vmatpush.msrb.mxu3 %v5165_v28 }
 0x182   : > { %2706 = vmatpush.msra.mxu1 %v2705_v27  ;;  %v2710_v47 = vsub.f32 %v5230_v62, %v5731_v16  ;;  %v2063_v27 = vsub.f32 %v5207_v22, %v5735_v37  ;;  %v5273_v16 = vsub.f32 %v303_v54, %v5237_v38  ;;  %v5779_v54 = vand.u32 4294901760, %v4911_v45  ;;  %2796 = vmatpush.msrb.mxu2 %v5177_v32 }
 0x183   : > { %v1485_v30 = vadd.f32 %v5161_v53, %v1404_v13  ;;  %2567 = vmatpush.msra.mxu0 %v5248_v48  ;;  %v5262_v61 = vsub.f32 %v354_v10, %v5248_v48  ;;  %v5264_v53 = vand.u32 4294901760, %v353_v12  ;;  %v5777_v25 = vand.u32 4294901760, %v5246_v1  ;;  %2876 = vmatpush.msrb.mxu3 %v5188_v41 }
 0x184   : > { %v1633_v4 = vpop.f32.mrf.mxu1  ;;  %v2711_v7 = vand.u32 4294901760, %v2710_v47  ;;  %v2070_v45 = vand.u32 4294901760, %v5273_v16  ;;  %2799 = vmatpush.msrb.mxu2 %v5201_v36 }
 0x185   : > { %v5266_v13 = vadd.f32 %v1629_v8, %v1485_v30  ;;  %2057 = vmatmul.f32.gmra.mxu2 %v2056_v46  ;;  %2190 = vmatmul.f32.gmra.mxu3 %v5077_v57  ;;  %v2716_v10 = vsub.f32 %v5246_v1, %v5777_v25  ;;  %v5738_v43 = vand.u32 4294901760, %v5262_v61  ;;  %v5281_v8 = vsub.f32 %v353_v12, %v5264_v53 }
 0x186   : > { %v1500_v63 = vpop.f32.mrf.mxu0  ;;  %2569 = vmatpush.msra.mxu0 %v5264_v53  ;;  %v5778_v46 = vand.u32 4294901760, %v5105_v2  ;;  %2712 = vmatpush.msra.mxu1 %v2711_v7 }
 0x187   : > { %v2717_v25 = vand.u32 4294901760, %v2716_v10  ;;  %v2722_v37 = vsub.f32 %v5262_v61, %v5738_v43  ;;  %v2727_v12 = vand.u32 4294901760, %v5281_v8  ;;  %v5780_v43 = vand.u32 4294901760, %v4935_v23  ;;  %2802 = vmatpush.msrb.mxu2 %v5230_v62  ;;  %2878 = vmatpush.msrb.mxu3 %v5216_v44 }
 0x188   : > { %2354 = vmatmul.f32.gmra.mxu1 %v5778_v46  ;;  %2937 = vmatpush.msrb.mxu0 %v5779_v54  ;;  %v1346_v47 = vpop.f32.mrf.mxu2  ;;  %v1407_v30 = vpop.f32.mrf.mxu3  ;;  %v2064_v46 = vand.u32 4294901760, %v2063_v27  ;;  %v276_v54 = vld [vmem:[%s3439_s9 + $0x18] sm:$0xff]  ;;  %v2071_v23 = vsub.f32 %v5273_v16, %v2070_v45 }
 0x189   : > { %v1347_v57 = vadd.f32 %v1346_v47, %v4938_v17  ;;  %v1408_v2 = vadd.f32 %v1407_v30, %v1343_v42  ;;  %2281 = vmatmul.f32.gmra.mxu0 %v5143_v31  ;;  %2718 = vmatpush.msra.mxu1 %v2717_v25  ;;  %v2723_v7 = vand.u32 4294901760, %v2722_v37  ;;  %v2728_v10 = vsub.f32 %v5281_v8, %v2727_v12 }
 0x18a   : > { %2941 = vmatpush.msrb.mxu0 %v5780_v43  ;;  %v5781_v47 = vand.u32 4294901760, %v4969_v33  ;;  %v5314_v43 = vand.u32 4294901760, %v276_v54  ;;  %v5782_v30 = vand.u32 4294901760, %v4992_v18  ;;  %v5783_v33 = vand.u32 4294901760, %v5143_v31  ;;  %v280_v31 = vld [vmem:[%s3439_s9 + $0x38] sm:$0xff]  ;;  %2805 = vmatpush.msrb.mxu2 %v5246_v1 }
 0x18b   : > { %v1493_v17 = vadd.f32 %v5212_v40, %v1408_v2  ;;  %2724 = vmatpush.msra.mxu1 %v2723_v7  ;;  %v2729_v27 = vand.u32 4294901760, %v2728_v10  ;;  %v5784_v2 = vand.u32 4294901760, %v5020_v21  ;;  %v2072_v10 = vand.u32 4294901760, %v2071_v23  ;;  %2880 = vmatpush.msrb.mxu3 %v5232_v19 }
 0x18c   : > { %v1637_v42 = vpop.f32.mrf.mxu1  ;;  %2945 = vmatpush.msrb.mxu0 %v5781_v47  ;;  %v5327_v18 = vsub.f32 %v276_v54, %v5314_v43  ;;  %v5336_v21 = vand.u32 4294901760, %v280_v31  ;;  %v5789_v47 = vand.u32 4294901760, %v5127_v56  ;;  %2808 = vmatpush.msrb.mxu2 %v5262_v61 }
 0x18d   : > { %v5308_v37 = vadd.f32 %v1633_v4, %v1493_v17  ;;  %2065 = vmatmul.f32.gmra.mxu2 %v2064_v46  ;;  %2194 = vmatmul.f32.gmra.mxu3 %v5120_v24  ;;  %v5785_v17 = vand.u32 4294901760, %v5045_v59 }
 0x18e   : > { %v1508_v40 = vpop.f32.mrf.mxu0  ;;  %2730 = vmatpush.msra.mxu1 %v2729_v27  ;;  %2949 = vmatpush.msrb.mxu0 %v5782_v30  ;;  %v5788_v27 = vand.u32 4294901760, %v5207_v22  ;;  %v5790_v30 = vand.u32 4294901760, %v5150_v5 }
 0x18f   : > { %2882 = vmatpush.msrb.mxu3 %v5248_v48  ;;  %2811 = vmatpush.msrb.mxu2 %v5281_v8 }
 0x190   : > { %2360 = vmatmul.f32.gmra.mxu1 %v5783_v33  ;;  %v1350_v4 = vpop.f32.mrf.mxu2  ;;  %v1411_v25 = vpop.f32.mrf.mxu3  ;;  %2953 = vmatpush.msrb.mxu0 %v5784_v2  ;;  %v5791_v33 = vand.u32 4294901760, %v5177_v32 }
 0x191   : > { %3032 = vmatpush.msrb.mxu1 %v4903_v58  ;;  %v1351_v46 = vadd.f32 %v1350_v4, %v4994_v26  ;;  %v1412_v7 = vadd.f32 %v1411_v25, %v1347_v57  ;;  %2286 = vmatmul.f32.gmra.mxu0 %v5207_v22  ;;  %v5786_v57 = vand.u32 4294901760, %v5072_v11  ;;  %v284_v22 = vld [vmem:[%s3439_s9 + $0x58] sm:$0xff]  ;;  %v5792_v25 = vand.u32 4294901760, %v5201_v36 }
 0x192   : > { %2957 = vmatpush.msrb.mxu0 %v5785_v17  ;;  %v5377_v5 = vand.u32 4294901760, %v284_v22  ;;  %2884 = vmatpush.msrb.mxu3 %v5264_v53 }
 0x193   : > { %3034 = vmatpush.msrb.mxu1 %v4925_v29  ;;  %v1501_v58 = vadd.f32 %v1500_v63, %v1412_v7  ;;  %v2572_v29 = vand.u32 4294901760, %v5327_v18  ;;  %v5787_v63 = vand.u32 4294901760, %v5096_v51  ;;  %v5794_v7 = vand.u32 4294901760, %v5246_v1 }
 0x194   : > { %v1641_v26 = vpop.f32.mrf.mxu1  ;;  %2961 = vmatpush.msrb.mxu0 %v5786_v57 }
 0x195   : > { %3036 = vmatpush.msrb.mxu1 %v4956_v49  ;;  %v5341_v54 = vadd.f32 %v1637_v42, %v1501_v58  ;;  %2073 = vmatmul.f32.gmra.mxu2 %v2072_v10  ;;  %v5352_v42 = vsub.f32 %v280_v31, %v5336_v21  ;;  %v2573_v51 = vsub.f32 %v5327_v18, %v2572_v29 }
 0x196   : > { %2198 = vmatmul.f32.gmra.mxu3 %v5181_v6  ;;  %v1516_v59 = vpop.f32.mrf.mxu0  ;;  %2965 = vmatpush.msrb.mxu0 %v5787_v63 }
 0x197   : > { %3038 = vmatpush.msrb.mxu1 %v4979_v9  ;;  %v2580_v56 = vand.u32 4294901760, %v5352_v42 }
 0x198   : > { %2366 = vmatmul.f32.gmra.mxu1 %v5788_v27  ;;  %v1354_v49 = vpop.f32.mrf.mxu2  ;;  %v1415_v11 = vpop.f32.mrf.mxu3  ;;  %2969 = vmatpush.msrb.mxu0 %v5789_v47 }
 0x199   : > { %3040 = vmatpush.msrb.mxu1 %v5008_v55  ;;  %v1355_v9 = vadd.f32 %v1354_v49, %v5047_v39  ;;  %v1416_v23 = vadd.f32 %v1415_v11, %v1351_v46  ;;  %2291 = vmatmul.f32.gmra.mxu0 %v5273_v16  ;;  %v2581_v2 = vsub.f32 %v5352_v42, %v2580_v56  ;;  %v5793_v46 = vand.u32 4294901760, %v5230_v62 }
 0x19a   : > { %2973 = vmatpush.msrb.mxu0 %v5790_v30  ;;  %v5393_v16 = vsub.f32 %v284_v22, %v5377_v5  ;;  %v5795_v62 = vand.u32 4294901760, %v5262_v61  ;;  %v5797_v30 = vld [vmem:[#allocation6_spill] sm:$0xff] }
 0x19b   : > { %3042 = vmatpush.msrb.mxu1 %v5031_v0  ;;  %v1509_v55 = vadd.f32 %v1508_v40, %v1416_v23  ;;  %v2574_v0 = vand.u32 4294901760, %v2573_v51  ;;  %v2582_v31 = vand.u32 4294901760, %v2581_v2  ;;  %v296_v23 = vld [vmem:[%s3439_s9 + $0xb8] sm:$0xff] }
 0x19c   : > { %v1645_v39 = vpop.f32.mrf.mxu1  ;;  %2977 = vmatpush.msrb.mxu0 %v5791_v33  ;;  %v5447_v33 = vand.u32 4294901760, %v296_v23 }
 0x19d   : > { %3044 = vmatpush.msrb.mxu1 %v5060_v15  ;;  %v5373_v4 = vadd.f32 %v1641_v26, %v1509_v55  ;;  %2441 = vmatmul.f32.vlgmr.msra.gmra.mxu2 %v4883_v34 }
 0x19e   : > { %2202 = vmatmul.f32.gmra.mxu3 %v5237_v38  ;;  %v1884_v40 = vpop.f32.mrf.mxu0  ;;  %2981 = vmatpush.msrb.mxu0 %v5792_v25 }
 0x19f   : > { %3046 = vmatpush.msrb.mxu1 %v5085_v20 }
 0x1a0   : > { %2372 = vmatmul.f32.gmra.mxu1 %v2070_v45  ;;  %v1419_v15 = vpop.f32.mrf.mxu3  ;;  %v1699_v32 = vpop.f32.mrf.mxu2  ;;  %2985 = vmatpush.msrb.mxu0 %v5793_v46  ;;  %v288_v45 = vld [vmem:[%s3439_s9 + $0x78] sm:$0xff] }
 0x1a1   : > { %3048 = vmatpush.msrb.mxu1 %v5114_v35  ;;  %v1420_v20 = vadd.f32 %v1419_v15, %v1355_v9  ;;  %v1700_v36 = vadd.f32 %v1699_v32, %v5098_v3  ;;  %2575 = vmatmul.f32.vlgmr.msra.gmra.mxu0 %v2574_v0  ;;  %v5408_v17 = vand.u32 4294901760, %v288_v45  ;;  %v300_v46 = vld [vmem:[%s3439_s9 + $0xd8] sm:$0xff] }
 0x1a2   : > { %2989 = vmatpush.msrb.mxu0 %v5794_v7  ;;  %v5798_v7 = vld [vmem:[#allocation7_spill] sm:$0xff] }
 0x1a3   : > { %3050 = vmatpush.msrb.mxu1 %v5137_v52  ;;  %v1517_v10 = vadd.f32 %v1516_v59, %v1420_v20  ;;  %v2588_v52 = vand.u32 4294901760, %v5393_v16  ;;  %v5420_v57 = vsub.f32 %v288_v45, %v5408_v17 }
 0x1a4   : > { %v1949_v35 = vpop.f32.mrf.mxu1  ;;  %2993 = vmatpush.msrb.mxu0 %v5795_v62 }
 0x1a5   : > { %3052 = vmatpush.msrb.mxu1 %v5165_v28  ;;  %v5403_v3 = vadd.f32 %v1645_v39, %v1517_v10  ;;  %2445 = vmatmul.f32.gmra.mxu2 %v4917_v50  ;;  %v2589_v26 = vsub.f32 %v5393_v16, %v2588_v52 }
 0x1a6   : > { %2506 = vmatmul.f32.vlgmr.msra.gmra.mxu3 %v4883_v34  ;;  %v1888_v1 = vpop.f32.mrf.mxu0  ;;  %2997 = vmatpush.msrb.mxu0 %v2727_v12 }
 0x1a7   : > { %3054 = vmatpush.msrb.mxu1 %v5188_v41  ;;  %v292_v41 = vld [vmem:[%s3439_s9 + $0x98] sm:$0xff] }
 0x1a8   : > { %2732 = vmatmul.f32.vlgmr.msra.gmra.mxu1 %v5314_v43  ;;  %v1704_v61 = vpop.f32.mrf.mxu2  ;;  %v1773_v28 = vpop.f32.mrf.mxu3  ;;  %v5430_v63 = vand.u32 4294901760, %v292_v41 }
 0x1a9   : > { %3056 = vmatpush.msrb.mxu1 %v5216_v44  ;;  %v1705_v34 = vadd.f32 %v1704_v61, %v5152_v60  ;;  %v1774_v58 = vadd.f32 %v1773_v28, %v1700_v36  ;;  %2583 = vmatmul.f32.gmra.mxu0 %v2582_v31  ;;  %v2590_v60 = vand.u32 4294901760, %v2589_v26  ;;  %v2596_v44 = vand.u32 4294901760, %v5420_v57  ;;  %v304_v26 = vld [vmem:[%s3439_s9 + $0xf8] sm:$0xff]  ;;  %s3096_s9 = sld [smem:[#allocation2]] }
 0x1aa   : > { %v5439_v9 = vsub.f32 %v292_v41, %v5430_v63 }
 0x1ab   : > { %3058 = vmatpush.msrb.mxu1 %v5232_v19  ;;  %v1885_v8 = vadd.f32 %v1884_v40, %v1774_v58 }
 0x1ac   : > { %v1953_v12 = vpop.f32.mrf.mxu1  ;;  %v2604_v39 = vand.u32 4294901760, %v5439_v9 }
 0x1ad   : > { %3060 = vmatpush.msrb.mxu1 %v5248_v48  ;;  %v5425_v59 = vadd.f32 %v1949_v35, %v1885_v8  ;;  %2449 = vmatmul.f32.gmra.mxu2 %v4962_v14  ;;  %v5796_v48 = vld [vmem:[#allocation8_spill] sm:$0xff]  ;;  %v5463_v35 = vand.u32 4294901760, %v300_v46 }
 0x1ae   : > { %2510 = vmatmul.f32.gmra.mxu3 %v4917_v50  ;;  %v1892_v27 = vpop.f32.mrf.mxu0  ;;  %v2597_v50 = vsub.f32 %v5420_v57, %v2596_v44  ;;  %v2605_v2 = vsub.f32 %v5439_v9, %v2604_v39 }
 0x1af   : > { %3062 = vmatpush.msrb.mxu1 %v5264_v53  ;;  %v5471_v58 = vsub.f32 %v300_v46, %v5463_v35 }
 0x1b0   : > { %2736 = vmatmul.f32.gmra.mxu1 %v5336_v21  ;;  %v1709_v19 = vpop.f32.mrf.mxu2  ;;  %v1779_v49 = vpop.f32.mrf.mxu3  ;;  %v2598_v55 = vand.u32 4294901760, %v2597_v50 }
 0x1b1   : > { %v1710_v11 = vadd.f32 %v1709_v19, %v5796_v48  ;;  %v1780_v47 = vadd.f32 %v1779_v49, %v1705_v34  ;;  %2591 = vmatmul.f32.gmra.mxu0 %v2590_v60 }
 0x1b3   : > { %v1889_v51 = vadd.f32 %v1888_v1, %v1780_v47 }
 0x1b4   : > { %v1957_v22 = vpop.f32.mrf.mxu1 }
 0x1b5   : > { %v5442_v53 = vadd.f32 %v1953_v12, %v1889_v51  ;;  %2453 = vmatmul.f32.gmra.mxu2 %v5797_v30 }
 0x1b6   : > { %2514 = vmatmul.f32.gmra.mxu3 %v4962_v14  ;;  %v1896_v0 = vpop.f32.mrf.mxu0  ;;  %v5455_v14 = vsub.f32 %v296_v23, %v5447_v33 }
 0x1b8   : > { %2740 = vmatmul.f32.gmra.mxu1 %v5377_v5  ;;  %v1714_v40 = vpop.f32.mrf.mxu2  ;;  %v1785_v25 = vpop.f32.mrf.mxu3  ;;  %v2612_v10 = vand.u32 4294901760, %v5455_v14 }
 0x1b9   : > { %v1715_v15 = vadd.f32 %v1714_v40, %v5266_v13  ;;  %v1786_v32 = vadd.f32 %v1785_v25, %v1710_v11  ;;  %2599 = vmatmul.f32.gmra.mxu0 %v2598_v55  ;;  %v2606_v13 = vand.u32 4294901760, %v2605_v2 }
 0x1ba   : > { %v2613_v34 = vsub.f32 %v5455_v14, %v2612_v10 }
 0x1bb   : > { %v1893_v20 = vadd.f32 %v1892_v27, %v1786_v32  ;;  %v5479_v27 = vand.u32 4294901760, %v304_v26 }
 0x1bc   : > { %v1961_v36 = vpop.f32.mrf.mxu1  ;;  %v2614_v60 = vand.u32 4294901760, %v2613_v34 }
 0x1bd   : > { %v5458_v45 = vadd.f32 %v1957_v22, %v1893_v20  ;;  %2457 = vmatmul.f32.gmra.mxu2 %v5798_v7  ;;  %v5487_v23 = vsub.f32 %v304_v26, %v5479_v27 }
 0x1be   : > { %2518 = vmatmul.f32.gmra.mxu3 %v5797_v30  ;;  %v1900_v62 = vpop.f32.mrf.mxu0 }
 0x1c0   : > { %2744 = vmatmul.f32.gmra.mxu1 %v5408_v17  ;;  %v1719_v31 = vpop.f32.mrf.mxu2  ;;  %v1791_v1 = vpop.f32.mrf.mxu3 }
 0x1c1   : > { %v1720_v61 = vadd.f32 %v1719_v31, %v5308_v37  ;;  %v1792_v28 = vadd.f32 %v1791_v1, %v1715_v15  ;;  %2607 = vmatmul.f32.gmra.mxu0 %v2606_v13  ;;  %v2620_v37 = vand.u32 4294901760, %v5471_v58 }
 0x1c3   : > { %v1897_v41 = vadd.f32 %v1896_v0, %v1792_v28  ;;  %v2621_v50 = vsub.f32 %v5471_v58, %v2620_v37 }
 0x1c4   : > { %v1965_v8 = vpop.f32.mrf.mxu1 }
 0x1c5   : > { %v5474_v12 = vadd.f32 %v1961_v36, %v1897_v41  ;;  %2461 = vmatmul.f32.gmra.mxu2 %v5120_v24  ;;  %v2622_v55 = vand.u32 4294901760, %v2621_v50 }
 0x1c6   : > { %2522 = vmatmul.f32.gmra.mxu3 %v5798_v7  ;;  %v1904_v19 = vpop.f32.mrf.mxu0 }
 0x1c8   : > { %2748 = vmatmul.f32.gmra.mxu1 %v5430_v63  ;;  %v1724_v49 = vpop.f32.mrf.mxu2  ;;  %v1797_v48 = vpop.f32.mrf.mxu3 }
 0x1c9   : > { %v1725_v11 = vadd.f32 %v1724_v49, %v5341_v54  ;;  %v1798_v47 = vadd.f32 %v1797_v48, %v1720_v61  ;;  %2615 = vmatmul.f32.gmra.mxu0 %v2614_v60  ;;  %v2628_v54 = vand.u32 4294901760, %v5487_v23 }
 0x1cb   : > { %v1901_v51 = vadd.f32 %v1900_v62, %v1798_v47  ;;  %v2629_v2 = vsub.f32 %v5487_v23, %v2628_v54 }
 0x1cc   : > { %v1969_v22 = vpop.f32.mrf.mxu1 }
 0x1cd   : > { %v5489_v30 = vadd.f32 %v1965_v8, %v1901_v51  ;;  %2465 = vmatmul.f32.gmra.mxu2 %v5181_v6 }
 0x1ce   : > { %2526 = vmatmul.f32.gmra.mxu3 %v5120_v24  ;;  %v1908_v0 = vpop.f32.mrf.mxu0  ;;  %v2630_v24 = vand.u32 4294901760, %v2629_v2 }
 0x1d0   : > { %2752 = vmatmul.f32.gmra.mxu1 %v5447_v33  ;;  %v1729_v40 = vpop.f32.mrf.mxu2  ;;  %v1803_v25 = vpop.f32.mrf.mxu3 }
 0x1d1   : > { %v1730_v15 = vadd.f32 %v1729_v40, %v5373_v4  ;;  %v1804_v32 = vadd.f32 %v1803_v25, %v1725_v11  ;;  %2623 = vmatmul.f32.gmra.mxu0 %v2622_v55 }
 0x1d3   : > { %v1905_v46 = vadd.f32 %v1904_v19, %v1804_v32 }
 0x1d4   : > { %v1973_v20 = vpop.f32.mrf.mxu1 }
 0x1d5   : > { %v5499_v36 = vadd.f32 %v1969_v22, %v1905_v46  ;;  %2469 = vmatmul.f32.gmra.mxu2 %v5237_v38 }
 0x1d6   : > { %2530 = vmatmul.f32.gmra.mxu3 %v5181_v6  ;;  %v1912_v7 = vpop.f32.mrf.mxu0 }
 0x1d8   : > { %2756 = vmatmul.f32.gmra.mxu1 %v5463_v35  ;;  %v1734_v13 = vpop.f32.mrf.mxu2  ;;  %v1809_v4 = vpop.f32.mrf.mxu3 }
 0x1d9   : > { %v1735_v62 = vadd.f32 %v1734_v13, %v5403_v3  ;;  %v1810_v31 = vadd.f32 %v1809_v4, %v1730_v15  ;;  %2631 = vmatmul.f32.gmra.mxu0 %v2630_v24 }
 0x1db   : > { %v1909_v1 = vadd.f32 %v1908_v0, %v1810_v31 }
 0x1dc   : > { %v1977_v61 = vpop.f32.mrf.mxu1 }
 0x1dd   : > { %v5505_v28 = vadd.f32 %v1973_v20, %v1909_v1  ;;  %2814 = vmatmul.f32.vlgmr.msrb.gmra.mxu2 %v5327_v18 }
 0x1de   : > { %2534 = vmatmul.f32.gmra.mxu3 %v5237_v38  ;;  %v2257_v34 = vpop.f32.mrf.mxu0 }
 0x1e0   : > { %2760 = vmatmul.f32.gmra.mxu1 %v5479_v27  ;;  %v1815_v6 = vpop.f32.mrf.mxu3  ;;  %v2018_v26 = vpop.f32.mrf.mxu2 }
 0x1e1   : > { %v1816_v41 = vadd.f32 %v1815_v6, %v1735_v62  ;;  %v2019_v8 = vadd.f32 %v2018_v26, %v5425_v59  ;;  %2999 = vmatmul.f32.vlgmr.msrb.gmra.mxu0 %v5314_v43 }
 0x1e3   : > { %v1913_v3 = vadd.f32 %v1912_v7, %v1816_v41 }
 0x1e4   : > { %v2331_v60 = vpop.f32.mrf.mxu1 }
 0x1e5   : > { %v5512_v19 = vadd.f32 %v1977_v61, %v1913_v3  ;;  %2819 = vmatmul.f32.gmra.mxu2 %v5352_v42 }
 0x1e6   : > { %2888 = vmatmul.f32.vlgmr.msrb.gmra.mxu3 %v2572_v29  ;;  %v2262_v38 = vpop.f32.mrf.mxu0 }
 0x1e8   : > { %3064 = vmatmul.f32.vlgmr.msrb.gmra.mxu1 %v5314_v43  ;;  %v2026_v49 = vpop.f32.mrf.mxu2  ;;  %v2175_v48 = vpop.f32.mrf.mxu3 }
 0x1e9   : > { %v2027_v11 = vadd.f32 %v2026_v49, %v5442_v53  ;;  %v2176_v47 = vadd.f32 %v2175_v48, %v2019_v8  ;;  %3003 = vmatmul.f32.gmra.mxu0 %v5336_v21 }
 0x1eb   : > { %v2258_v59 = vadd.f32 %v2257_v34, %v2176_v47 }
 0x1ec   : > { %v2337_v50 = vpop.f32.mrf.mxu1 }
 0x1ed   : > { %v5520_v51 = vadd.f32 %v2331_v60, %v2258_v59  ;;  %2824 = vmatmul.f32.gmra.mxu2 %v5393_v16 }
 0x1ee   : > { %2894 = vmatmul.f32.gmra.mxu3 %v2580_v56  ;;  %v2267_v18 = vpop.f32.mrf.mxu0 }
 0x1f0   : > { %3068 = vmatmul.f32.gmra.mxu1 %v5336_v21  ;;  %v2034_v43 = vpop.f32.mrf.mxu2  ;;  %v2179_v29 = vpop.f32.mrf.mxu3 }
 0x1f1   : > { %v2035_v22 = vadd.f32 %v2034_v43, %v5458_v45  ;;  %v2180_v53 = vadd.f32 %v2179_v29, %v2027_v11  ;;  %3007 = vmatmul.f32.gmra.mxu0 %v5377_v5 }
 0x1f3   : > { %v2263_v55 = vadd.f32 %v2262_v38, %v2180_v53 }
 0x1f4   : > { %v2343_v0 = vpop.f32.mrf.mxu1 }
 0x1f5   : > { %v5528_v40 = vadd.f32 %v2337_v50, %v2263_v55  ;;  %2829 = vmatmul.f32.gmra.mxu2 %v5420_v57 }
 0x1f6   : > { %2900 = vmatmul.f32.gmra.mxu3 %v2588_v52  ;;  %v2272_v42 = vpop.f32.mrf.mxu0 }
 0x1f8   : > { %3072 = vmatmul.f32.gmra.mxu1 %v5377_v5  ;;  %v2042_v21 = vpop.f32.mrf.mxu2  ;;  %v2183_v56 = vpop.f32.mrf.mxu3 }
 0x1f9   : > { %v2043_v25 = vadd.f32 %v2042_v21, %v5474_v12  ;;  %v2184_v45 = vadd.f32 %v2183_v56, %v2035_v22  ;;  %3011 = vmatmul.f32.gmra.mxu0 %v5408_v17 }
 0x1fb   : > { %v2268_v15 = vadd.f32 %v2267_v18, %v2184_v45 }
 0x1fc   : > { %v2349_v32 = vpop.f32.mrf.mxu1 }
 0x1fd   : > { %v5536_v2 = vadd.f32 %v2343_v0, %v2268_v15  ;;  %2834 = vmatmul.f32.gmra.mxu2 %v5439_v9 }
 0x1fe   : > { %2906 = vmatmul.f32.gmra.mxu3 %v2596_v44  ;;  %v2277_v16 = vpop.f32.mrf.mxu0 }
 0x200   : > { %3076 = vmatmul.f32.gmra.mxu1 %v5408_v17  ;;  %v2050_v5 = vpop.f32.mrf.mxu2  ;;  %v2187_v52 = vpop.f32.mrf.mxu3 }
 0x201   : > { %v2051_v46 = vadd.f32 %v2050_v5, %v5489_v30  ;;  %v2188_v12 = vadd.f32 %v2187_v52, %v2043_v25  ;;  %3015 = vmatmul.f32.gmra.mxu0 %v5430_v63 }
 0x203   : > { %v2273_v20 = vadd.f32 %v2272_v42, %v2188_v12 }
 0x205   : > { %v2355_v24 = vpop.f32.mrf.mxu1  ;;  %v5544_v7 = vadd.f32 %v2349_v32, %v2273_v20  ;;  %2839 = vmatmul.f32.gmra.mxu2 %v5455_v14 }
 0x206   : > { %2912 = vmatmul.f32.gmra.mxu3 %v2604_v39  ;;  %v2282_v57 = vpop.f32.mrf.mxu0 }
 0x208   : > { %3080 = vmatmul.f32.gmra.mxu1 %v5430_v63  ;;  %v2058_v17 = vpop.f32.mrf.mxu2  ;;  %v2191_v44 = vpop.f32.mrf.mxu3 }
 0x209   : > { %v2059_v13 = vadd.f32 %v2058_v17, %v5499_v36  ;;  %v2192_v30 = vadd.f32 %v2191_v44, %v2051_v46  ;;  %3019 = vmatmul.f32.gmra.mxu0 %v5447_v33 }
 0x20b   : > { %v2278_v4 = vadd.f32 %v2277_v16, %v2192_v30 }
 0x20d   : > { %v2361_v62 = vpop.f32.mrf.mxu1  ;;  %v5552_v31 = vadd.f32 %v2355_v24, %v2278_v4  ;;  %2844 = vmatmul.f32.gmra.mxu2 %v5471_v58 }
 0x20e   : > { %2918 = vmatmul.f32.gmra.mxu3 %v2612_v10  ;;  %v2287_v9 = vpop.f32.mrf.mxu0 }
 0x210   : > { %3084 = vmatmul.f32.gmra.mxu1 %v5447_v33  ;;  %v2066_v63 = vpop.f32.mrf.mxu2  ;;  %v2195_v39 = vpop.f32.mrf.mxu3 }
 0x211   : > { %v2067_v1 = vadd.f32 %v2066_v63, %v5505_v28  ;;  %v2196_v36 = vadd.f32 %v2195_v39, %v2059_v13  ;;  %3023 = vmatmul.f32.gmra.mxu0 %v5463_v35 }
 0x213   : > { %v2283_v61 = vadd.f32 %v2282_v57, %v2196_v36 }
 0x215   : > { %v2367_v34 = vpop.f32.mrf.mxu1  ;;  %v5560_v6 = vadd.f32 %v2361_v62, %v2283_v61  ;;  %2849 = vmatmul.f32.gmra.mxu2 %v5487_v23 }
 0x216   : > { %2924 = vmatmul.f32.gmra.mxu3 %v2620_v37  ;;  %v2292_v14 = vpop.f32.mrf.mxu0 }
 0x218   : > { %3088 = vmatmul.f32.gmra.mxu1 %v5463_v35  ;;  %v2074_v33 = vpop.f32.mrf.mxu2 }
 0x219   : > { %v2199_v10 = vpop.f32.mrf.mxu3  ;;  %v2075_v26 = vadd.f32 %v2074_v33, %v5512_v19  ;;  %3027 = vmatmul.f32.gmra.mxu0 %v5479_v27 }
 0x21a   : > { %v2200_v28 = vadd.f32 %v2199_v10, %v2067_v1  ;;  %v5612_v10 = vstv %s3096_s9 }
 0x21c   : > { %v2288_v41 = vadd.f32 %v2287_v9, %v2200_v28 }
 0x21d   : > { %v2373_v8 = vpop.f32.mrf.mxu1 }
 0x21e   : > { %v5568_v3 = vadd.f32 %v2367_v34, %v2288_v41  ;;  %2930 = vmatmul.f32.gmra.mxu3 %v2628_v54  ;;  %v2576_v60 = vpop.f32.mrf.mxu0 }
 0x220   : > { %3092 = vmatmul.f32.gmra.mxu1 %v5479_v27  ;;  %v2442_v37 = vpop.f32.mrf.mxu2 }
 0x221   : > { %v2203_v58 = vpop.f32.mrf.mxu3  ;;  %v2443_v20 = vadd.f32 %v2442_v37, %v5520_v51 }
 0x222   : > { %v2204_v35 = vadd.f32 %v2203_v58, %v2075_v26 }
 0x224   : > { %v2293_v38 = vadd.f32 %v2292_v14, %v2204_v35 }
 0x225   : > { %v2733_v49 = vpop.f32.mrf.mxu1 }
 0x226   : > { %v5573_v48 = vadd.f32 %v2373_v8, %v2293_v38  ;;  %v2584_v19 = vpop.f32.mrf.mxu0 }
 0x228   : > { %v2446_v11 = vpop.f32.mrf.mxu2 }
 0x229   : > { %v2507_v47 = vpop.f32.mrf.mxu3  ;;  %v2447_v4 = vadd.f32 %v2446_v11, %v5528_v40 }
 0x22a   : > { %v2508_v57 = vadd.f32 %v2507_v47, %v2443_v20 }
 0x22c   : > { %v2577_v30 = vadd.f32 %v2576_v60, %v2508_v57 }
 0x22d   : > { %v2737_v59 = vpop.f32.mrf.mxu1 }
 0x22e   : > { %v2592_v50 = vpop.f32.mrf.mxu0  ;;  %v2734_v9 = vadd.f32 %v2733_v49, %v2577_v30 }
 0x230   : > { %v2450_v18 = vpop.f32.mrf.mxu2 }
 0x231   : > { %v2511_v43 = vpop.f32.mrf.mxu3  ;;  %v2451_v14 = vadd.f32 %v2450_v18, %v5536_v2 }
 0x232   : > { %v2512_v63 = vadd.f32 %v2511_v43, %v2447_v4 }
 0x234   : > { %v2585_v51 = vadd.f32 %v2584_v19, %v2512_v63 }
 0x235   : > { %v2741_v29 = vpop.f32.mrf.mxu1 }
 0x236   : > { %v5575_v23 = vpop.f32.mrf.mxu0  ;;  %v2738_v28 = vadd.f32 %v2737_v59, %v2585_v51 }
 0x238   : > { %v2454_v54 = vpop.f32.mrf.mxu2 }
 0x239   : > { %v2515_v22 = vpop.f32.mrf.mxu3  ;;  %v2455_v49 = vadd.f32 %v2454_v54, %v5544_v7 }
 0x23a   : > { %v2516_v41 = vadd.f32 %v2515_v22, %v2451_v14 }
 0x23c   : > { %v2593_v35 = vadd.f32 %v2592_v50, %v2516_v41 }
 0x23d   : > { %v5577_v27 = vpop.f32.mrf.mxu1 }
 0x23e   : > { %v5579_v53 = vpop.f32.mrf.mxu0  ;;  %v2742_v47 = vadd.f32 %v2741_v29, %v2593_v35 }
 0x240   : > { %v5581_v55 = vpop.f32.mrf.mxu2 }
 0x241   : > { %v2519_v0 = vpop.f32.mrf.mxu3  ;;  %v2459_v7 = vadd.f32 %v5581_v55, %v5552_v31 }
 0x242   : > { %v2520_v59 = vadd.f32 %v2519_v0, %v2455_v49 }
 0x245   : > { %v5583_v42 = vpop.f32.mrf.mxu1 }
 0x246   : > { %v5585_v21 = vpop.f32.mrf.mxu0 }
 0x248   : > { %v5587_v56 = vpop.f32.mrf.mxu2 }
 0x249   : > { %v2523_v25 = vpop.f32.mrf.mxu3  ;;  %v2463_v31 = vadd.f32 %v5587_v56, %v5560_v6 }
 0x24a   : > { %v2524_v0 = vadd.f32 %v2523_v25, %v2459_v7 }
 0x24d   : > { %v5589_v45 = vpop.f32.mrf.mxu1 }
 0x24e   : > { %v5591_v15 = vpop.f32.mrf.mxu0 }
 0x250   : > { %v5593_v32 = vpop.f32.mrf.mxu2 }
 0x251   : > { %v5595_v16 = vpop.f32.mrf.mxu3  ;;  %v2467_v6 = vadd.f32 %v5593_v32, %v5568_v3 }
 0x252   : > { %v2528_v25 = vadd.f32 %v5595_v16, %v2463_v31 }
 0x255   : > { %v5597_v5 = vpop.f32.mrf.mxu1 }
 0x256   : > { %v5599_v52 = vpop.f32.mrf.mxu0 }
 0x258   : > { %v5601_v46 = vpop.f32.mrf.mxu2 }
 0x259   : > { %v5603_v12 = vpop.f32.mrf.mxu3  ;;  %v2471_v3 = vadd.f32 %v5601_v46, %v5573_v48 }
 0x25a   : > { %v2532_v16 = vadd.f32 %v5603_v12, %v2467_v6 }
 0x25d   : > { %v5606_v24 = vpop.f32.mrf.mxu1 }
 0x25e   : > { %v3000_v17 = vpop.f32.mrf.mxu0 }
 0x260   : > { %v2815_v13 = vpop.f32.mrf.mxu2 }
 0x261   : > { %v5608_v44 = vpop.f32.mrf.mxu3  ;;  %v2816_v1 = vadd.f32 %v2815_v13, %v2734_v9  ;;  %v2601_v13 = vadd.f32 %v5575_v23, %v2520_v59  ;;  %v2609_v23 = vadd.f32 %v5579_v53, %v2524_v0 }
 0x262   : > { %v2536_v12 = vadd.f32 %v5608_v44, %v2471_v3 }
 0x263   : > { %v2746_v29 = vadd.f32 %v5577_v27, %v2601_v13  ;;  %v2750_v27 = vadd.f32 %v5583_v42, %v2609_v23 }
 0x264   : > { %v2633_v59 = vadd.f32 %v5599_v52, %v2536_v12 }
 0x265   : > { %v3065_v62 = vpop.f32.mrf.mxu1 }
 0x266   : > { %v3004_v39 = vpop.f32.mrf.mxu0 }
 0x268   : > { %v2820_v36 = vpop.f32.mrf.mxu2 }
 0x269   : > { %v2889_v61 = vpop.f32.mrf.mxu3  ;;  %v2821_v60 = vadd.f32 %v2820_v36, %v2738_v28 }
 0x26a   : > { %v2890_v34 = vadd.f32 %v2889_v61, %v2816_v1 }
 0x26c   : > { %v3001_v33 = vadd.f32 %v3000_v17, %v2890_v34 }
 0x26d   : > { %v3069_v26 = vpop.f32.mrf.mxu1 }
 0x26e   : > { %v3066_v40 = vadd.f32 %v3065_v62, %v3001_v33  ;;  %v3008_v8 = vpop.f32.mrf.mxu0 }
 0x270   : > { %v3098_v58 = vadd.f32 %v5612_v10, %v3066_v40  ;;  %v2825_v2 = vpop.f32.mrf.mxu2 }
 0x271   : > { %v2895_v37 = vpop.f32.mrf.mxu3  ;;  %v2826_v43 = vadd.f32 %v2825_v2, %v2742_v47 }
 0x272   : > { %3107 = vst.msk [vmem:[%s5619_s6] sm:$0xff] %vm3106_vm1, %v3098_v58  ;;  %v2896_v38 = vadd.f32 %v2895_v37, %v2821_v60 }
 0x274   : > { %v3005_v19 = vadd.f32 %v3004_v39, %v2896_v38 }
 0x275   : > { %v3073_v11 = vpop.f32.mrf.mxu1 }
 0x276   : > { %v3070_v18 = vadd.f32 %v3069_v26, %v3005_v19  ;;  %v3012_v20 = vpop.f32.mrf.mxu0  ;;  %v2617_v26 = vadd.f32 %v5585_v21, %v2528_v25  ;;  %v2625_v21 = vadd.f32 %v5591_v15, %v2532_v16 }
 0x278   : > { %v3099_v22 = vadd.f32 %v5612_v10, %v3070_v18  ;;  %v2830_v57 = vpop.f32.mrf.mxu2  ;;  %v2754_v42 = vadd.f32 %v5589_v45, %v2617_v26  ;;  %v2758_v45 = vadd.f32 %v5597_v5, %v2625_v21  ;;  %v2762_v5 = vadd.f32 %v5606_v24, %v2633_v59 }
 0x279   : > { %v2901_v17 = vpop.f32.mrf.mxu3  ;;  %v2831_v62 = vadd.f32 %v2830_v57, %v2746_v29 }
 0x27a   : > { %3108 = vst.msk [vmem:[%s5619_s6 + $0x8] sm:$0xff] %vm3106_vm1, %v3099_v22  ;;  %v2902_v50 = vadd.f32 %v2901_v17, %v2826_v43 }
 0x27c   : > { %v3009_v54 = vadd.f32 %v3008_v8, %v2902_v50 }
 0x27d   : > { %v3077_v30 = vpop.f32.mrf.mxu1 }
 0x27e   : > { %v3074_v4 = vadd.f32 %v3073_v11, %v3009_v54  ;;  %v3016_v36 = vpop.f32.mrf.mxu0 }
 0x280   : > { %v3100_v9 = vadd.f32 %v5612_v10, %v3074_v4  ;;  %v2835_v63 = vpop.f32.mrf.mxu2 }
 0x281   : > { %v2907_v39 = vpop.f32.mrf.mxu3  ;;  %v2836_v34 = vadd.f32 %v2835_v63, %v2750_v27 }
 0x282   : > { %3109 = vst.msk [vmem:[%s5619_s6 + $0x10] sm:$0xff] %vm3106_vm1, %v3100_v9  ;;  %v2908_v1 = vadd.f32 %v2907_v39, %v2831_v62 }
 0x284   : > { %v3013_v55 = vadd.f32 %v3012_v20, %v2908_v1 }
 0x285   : > { %v3081_v61 = vpop.f32.mrf.mxu1 }
 0x286   : > { %v3078_v51 = vadd.f32 %v3077_v30, %v3013_v55  ;;  %v3020_v41 = vpop.f32.mrf.mxu0 }
 0x288   : > { %v3101_v14 = vadd.f32 %v5612_v10, %v3078_v51  ;;  %v2840_v33 = vpop.f32.mrf.mxu2 }
 0x289   : > { %v2913_v53 = vpop.f32.mrf.mxu3  ;;  %v2841_v60 = vadd.f32 %v2840_v33, %v2754_v42 }
 0x28a   : > { %3110 = vst.msk [vmem:[%s5619_s6 + $0x18] sm:$0xff] %vm3106_vm1, %v3101_v14  ;;  %v2914_v28 = vadd.f32 %v2913_v53, %v2836_v34 }
 0x28c   : > { %v3017_v56 = vadd.f32 %v3016_v36, %v2914_v28 }
 0x28d   : > { %v3085_v8 = vpop.f32.mrf.mxu1 }
 0x28e   : > { %v3082_v40 = vadd.f32 %v3081_v61, %v3017_v56  ;;  %v3024_v49 = vpop.f32.mrf.mxu0 }
 0x290   : > { %v3102_v58 = vadd.f32 %v5612_v10, %v3082_v40  ;;  %v2845_v35 = vpop.f32.mrf.mxu2 }
 0x291   : > { %v2919_v2 = vpop.f32.mrf.mxu3  ;;  %v2846_v19 = vadd.f32 %v2845_v35, %v2758_v45 }
 0x292   : > { %3111 = vst.msk [vmem:[%s5619_s6 + $0x20] sm:$0xff] %vm3106_vm1, %v3102_v58  ;;  %v2920_v37 = vadd.f32 %v2919_v2, %v2841_v60 }
 0x294   : > { %v3021_v32 = vadd.f32 %v3020_v41, %v2920_v37 }
 0x295   : > { %v3089_v15 = vpop.f32.mrf.mxu1 }
 0x296   : > { %v3086_v38 = vadd.f32 %v3085_v8, %v3021_v32  ;;  %v3028_v57 = vpop.f32.mrf.mxu0 }
 0x298   : > { %v3103_v11 = vadd.f32 %v5612_v10, %v3086_v38  ;;  %v2850_v46 = vpop.f32.mrf.mxu2 }
 0x299   : > { %v2925_v47 = vpop.f32.mrf.mxu3  ;;  %v2851_v44 = vadd.f32 %v2850_v46, %v2762_v5 }
 0x29a   : > { %3112 = vst.msk [vmem:[%s5619_s6 + $0x28] sm:$0xff] %vm3106_vm1, %v3103_v11  ;;  %v2926_v18 = vadd.f32 %v2925_v47, %v2846_v19 }
 0x29c   : > { %v3025_v48 = vadd.f32 %v3024_v49, %v2926_v18 }
 0x29d   : > { %v3093_v13 = vpop.f32.mrf.mxu1 }
 0x29e   : > { %v3090_v43 = vadd.f32 %v3089_v15, %v3025_v48 }
 0x2a0   : > { %v3104_v22 = vadd.f32 %v5612_v10, %v3090_v43 }
 0x2a1   : > { %v2931_v20 = vpop.f32.mrf.mxu3 }
 0x2a2   : > { %3113 = vst.msk [vmem:[%s5619_s6 + $0x30] sm:$0xff] %vm3106_vm1, %v3104_v22  ;;  %v2932_v17 = vadd.f32 %v2931_v20, %v2851_v44 }
 0x2a4   : > { %v3029_v50 = vadd.f32 %v3028_v57, %v2932_v17 }
 0x2a6   : > { %v3094_v52 = vadd.f32 %v3093_v13, %v3029_v50 }
 0x2a8   : > { %v3105_v7 = vadd.f32 %v5612_v10, %v3094_v52 }
 0x2aa   : > { %3114 = vst.msk [vmem:[%s5619_s6 + $0x38] sm:$0xff] %vm3106_vm1, %v3105_v7 }
 0x2ab PF: > { %p16_p7 = scmp.ge.s32.totalorder %s3390_s24, 6   ;;  %s5799_s20 = smov %s3325_s21 }
 0x2ac   : > { %s5800_s21 = smov %s3329_s22  ;;  %s5801_s22 = smov %s3400_s27 }
 0x2ad   : > { %s5802_s23 = smov %s3390_s24  ;;  %18 = sbr.rel (!%p16_p7) target bundleno = 5 (0x5), region = 83 }
 0x2b2   :  { %3137 = vsyncpa [#allocation4], 1 }
 0x2b3   :  { %3139 = vsyncpa [#allocation4 + $0x1], 1 }

</bundles_post_ra>
